<compile_context>
chip_gen: v7x
topology: tpu7x:2x2x1
jax: 0.10.0
libtpu: 0.0.40
codegen_flags: <defaults>
</compile_context>

<pallas_src>
import functools

import jax
import jax.numpy as jnp
from jax.experimental import pallas as pl
from jax.experimental.pallas import tpu as pltpu

D_IN = 768
D_HID = 256


def mm_attention_kernel(x_ref, y_ref, w1_ref, b1_ref, w2_ref, b2_ref,
                        o_ref, acc_ref, *, L, tL, need_mask):
    li = pl.program_id(1)
    n_l = pl.num_programs(1)

    # --- init accumulators at the first sequence step ------------------------
    @pl.when(li == 0)
    def _():
        shp = acc_ref.shape[1:]
        acc_ref[0] = jnp.full(shp, -jnp.inf, jnp.float32)   # running max(x)
        acc_ref[1] = jnp.zeros(shp, jnp.float32)            # running sum(x)
        acc_ref[2] = jnp.full(shp, -jnp.inf, jnp.float32)   # running max(y)
        acc_ref[3] = jnp.zeros(shp, jnp.float32)            # running sum(y)

    # --- streaming reduction over this sequence tile --------------------------
    def accumulate(masked):
        def upd(slot_max, slot_sum, ref):
            v = ref[...]                                    # (bB, tile, 768)
            if masked:
                seq_idx = jax.lax.broadcasted_iota(jnp.int32, v.shape, 1)
                valid = seq_idx < (L - li * tL)
                v_max = jnp.where(valid, v, -jnp.inf)
                v_sum = jnp.where(valid, v, 0)
            else:
                v_max, v_sum = v, v
            acc_ref[slot_max] = jnp.maximum(
                acc_ref[slot_max], jnp.max(v_max, axis=1).astype(jnp.float32))
            acc_ref[slot_sum] = acc_ref[slot_sum] + jnp.sum(
                v_sum, axis=1, dtype=jnp.float32)

        # x is fully reduced before y is read (smaller live vreg/VMEM set).
        upd(0, 1, x_ref)
        upd(2, 3, y_ref)

    if need_mask:
        # Only the tail tile pays for the masking selects.
        @pl.when(li == n_l - 1)
        def _():
            accumulate(masked=True)

        @pl.when(li != n_l - 1)
        def _():
            accumulate(masked=False)
    else:
        accumulate(masked=False)

    # --- finalize: stacked MLP + sigmoid epilogue at the last sequence step ---
    @pl.when(li == n_l - 1)
    def _():
        inv_l = jnp.float32(1.0 / L)
        bB = acc_ref.shape[1]

        # (4*bB, 768): [x_max; x_avg; y_max; y_avg] stacked -> one MXU matmul.
        pooled = jnp.concatenate(
            [acc_ref[0], acc_ref[1] * inv_l, acc_ref[2], acc_ref[3] * inv_l],
            axis=0)

        w1 = w1_ref[...]            # (768, 256)  VMEM-resident, single-buffered
        b1 = b1_ref[...]            # (1, 256)
        w2 = w2_ref[...]            # (256, 768)
        b2 = b2_ref[...]            # (1, 768)

        # Linear(768->256) + ReLU for all four branches at once.
        # TODO(synk): Dropout(0.25) is identity in eval mode; training-mode
        # stochastic dropout is not implemented here.
        h4 = jnp.maximum(
            jnp.dot(pooled, w1, preferred_element_type=jnp.float32) + b1, 0.0)

        # Second Linear is linear -> sum the four hidden branches first, then a
        # single (bB,256)x(256,768) matmul; its bias contributes 4*b2.
        h = (h4[0 * bB:1 * bB] + h4[1 * bB:2 * bB]
             + h4[2 * bB:3 * bB] + h4[3 * bB:4 * bB])
        out = jnp.dot(h, w2, preferred_element_type=jnp.float32) + 4.0 * b2
        o_ref[...] = jax.nn.sigmoid(out).astype(o_ref.dtype)


def _pick_seq_tile(L, seq_tile):
    """Seq tile: prefer a multiple-of-16 divisor of L near the target (no mask)."""
    if L <= seq_tile:
        return L
    base = max(16, (seq_tile // 16) * 16)
    cand = base
    while cand >= max(16, base // 2):
        if L % cand == 0:
            return cand
        cand -= 16
    return base


def mm_attention(x, y, w1, b1, w2, b2, *, seq_tile=512,
                 vmem_budget_bytes=50 * 1024 * 1024):
    B, L, D = x.shape
    assert D == D_IN
    assert y.shape == (B, L, D)
    assert x.dtype == y.dtype

    orig_B = B
    if B % 8 == 0:
        bB = 8
    elif B < 8:
        bB = B          # block == full batch dim -> legal, tiny footprint
    else:
        # Never bB=B for large non-multiple-of-8 batches (VMEM blow-up):
        # zero-pad the batch and slice the padded rows off afterwards.
        B_pad = pl.cdiv(B, 8) * 8
        pad = B_pad - B
        x = jnp.pad(x, ((0, pad), (0, 0), (0, 0)))
        y = jnp.pad(y, ((0, pad), (0, 0), (0, 0)))
        B = B_pad
        bB = 8

    itemsize = jnp.dtype(x.dtype).itemsize
    tL = _pick_seq_tile(L, seq_tile)

    # Explicit VMEM budget: 2 inputs x 2 pipeline buffers of (bB, tL, 768),
    # single-buffered weights, f32 accumulators, double-buffered output.
    weights_bytes = (D_IN * D_HID + D_HID + D_HID * D_IN + D_IN) * 4
    acc_bytes = 4 * bB * D_IN * 4
    out_bytes = 2 * bB * D_IN * itemsize

    def footprint(t):
        return (2 * 2 * bB * t * D_IN * itemsize
                + weights_bytes + acc_bytes + out_bytes)

    while tL > 16 and footprint(tL) > vmem_budget_bytes:
        tL = max(16, (tL // 2) // 16 * 16)

    n_l = pl.cdiv(L, tL)
    need_mask = (L % tL) != 0
    vmem_limit = max(int(footprint(tL)) + (6 << 20), 32 << 20)

    kernel = functools.partial(mm_attention_kernel, L=L, tL=tL,
                               need_mask=need_mask)

    bytes_accessed = int(2 * B * L * D_IN * itemsize + weights_bytes
                         + B * D_IN * itemsize)
    flops = int(2 * 2 * B * L * D_IN                    # max + sum streams
                + 2 * 4 * B * D_IN * D_HID              # stacked first Linear
                + 2 * B * D_HID * D_IN)                 # fused second Linear
    cost = pl.CostEstimate(flops=flops, transcendentals=B * D_IN,
                           bytes_accessed=bytes_accessed)

    def stream_spec():
        return pl.BlockSpec((bB, tL, D_IN), lambda bi, li: (bi, li, 0))

    def const_spec(shape):
        # Constant index_map -> fetched once; single buffer saves VMEM.
        return pl.BlockSpec(shape, lambda bi, li: (0, 0),
                            pipeline_mode=pl.Buffered(1))

    grid_spec = pltpu.PrefetchScalarGridSpec(
        num_scalar_prefetch=0,
        grid=(B // bB, n_l),
        in_specs=[
            stream_spec(),                       # x
            stream_spec(),                       # y
            const_spec((D_IN, D_HID)),           # w1
            const_spec((1, D_HID)),              # b1
            const_spec((D_HID, D_IN)),           # w2
            const_spec((1, D_IN)),               # b2
        ],
        out_specs=pl.BlockSpec((bB, D_IN), lambda bi, li: (bi, 0)),
        scratch_shapes=[pltpu.VMEM((4, bB, D_IN), jnp.float32)],
    )

    # TODO(synk): for B <= 8 on v7x the single "parallel" batch tile leaves the
    # second TensorCore idle; a D-chunked pooling grid + separate epilogue call
    # would recover it and is not implemented here.
    out = pl.pallas_call(
        kernel,
        out_shape=jax.ShapeDtypeStruct((B, D_IN), x.dtype),
        grid_spec=grid_spec,
        compiler_params=pltpu.CompilerParams(
            dimension_semantics=("parallel", "arbitrary"),
            vmem_limit_bytes=vmem_limit,
        ),
        cost_estimate=cost,
    )(x, y, w1, b1.reshape(1, D_HID), w2, b2.reshape(1, D_IN))

    return out[:orig_B] if orig_B != B else out


def _reference(x, y, w1, b1, w2, b2):
    def mlp(v):
        return jnp.maximum(v @ w1 + b1, 0.0) @ w2 + b2

    def pool(a):
        af = a.astype(jnp.float32)
        return jnp.max(af, axis=1), jnp.mean(af, axis=1)

    xm, xa = pool(x)
    ym, ya = pool(y)
    return jax.nn.sigmoid(mlp(xm) + mlp(xa) + mlp(ym) + mlp(ya))


if __name__ == "__main__":
    key = jax.random.PRNGKey(0)
    _, _, k1, k2, k3, k4 = jax.random.split(key, 6)

    # Deterministic parameter init (PyTorch nn.Linear style: U(-1/sqrt(fan_in), +)).
    lim1 = 1.0 / (D_IN ** 0.5)
    lim2 = 1.0 / (D_HID ** 0.5)
    w1 = jax.random.uniform(k1, (D_IN, D_HID), jnp.float32, -lim1, lim1)
    b1 = jax.random.uniform(k2, (D_HID,), jnp.float32, -lim1, lim1)
    w2 = jax.random.uniform(k3, (D_HID, D_IN), jnp.float32, -lim2, lim2)
    b2 = jax.random.uniform(k4, (D_IN,), jnp.float32, -lim2, lim2)

    def run_case(B, L, dtype, atol):
        kxx, kyy = jax.random.split(jax.random.fold_in(key, B * 100003 + L), 2)
        x = jax.random.normal(kxx, (B, L, D_IN), jnp.float32).astype(dtype)
        y = jax.random.normal(kyy, (B, L, D_IN), jnp.float32).astype(dtype)
        out = mm_attention(x, y, w1, b1, w2, b2)
        jax.block_until_ready(out)
        ref = _reference(x, y, w1, b1, w2, b2)
        assert out.shape == (B, D_IN), out.shape
        err = float(jnp.max(jnp.abs(out.astype(jnp.float32) - ref)))
        assert err < atol, (B, L, str(dtype), err)

    # Small canonical case (single seq tile, bB = B < 8).
    run_case(2, 8, jnp.float32, 1e-4)
    # Multi-step streaming reduction, divisor seq tile (no tail mask), bB = 8.
    run_case(8, 640, jnp.float32, 1e-4)
    # Batch padding (12 -> 16) + masked tail seq tile (520 = 512 + 8).
    run_case(12, 520, jnp.float32, 1e-4)
    # bf16 streaming (halves HBM bytes); accumulation stays f32 in-kernel.
    run_case(4, 32, jnp.bfloat16, 3e-2)

    print("KERNEL_OK")
</pallas_src>

<mosaic_0001>
module attributes {stable_mosaic.version = 11 : i64} {
  func.func @mm_attention_kernel(%arg0: i32, %arg1: i32, %arg2: memref<2x8x768xf32, #tpu.memory_space<vmem>>, %arg3: memref<2x8x768xf32, #tpu.memory_space<vmem>>, %arg4: memref<768x256xf32, #tpu.memory_space<vmem>>, %arg5: memref<1x256xf32, #tpu.memory_space<vmem>>, %arg6: memref<256x768xf32, #tpu.memory_space<vmem>>, %arg7: memref<1x768xf32, #tpu.memory_space<vmem>>, %arg8: memref<2x768xf32, #tpu.memory_space<vmem>>, %arg9: memref<4x2x768xf32, #tpu.memory_space<vmem>>) attributes {dimension_semantics = [#tpu.dimension_semantics<parallel>, #tpu.dimension_semantics<arbitrary>], iteration_bounds = array<i64: 1, 1>, scalar_prefetch = 0 : i64, scratch_operands = 1 : i64, tpu.core_type = #tpu.core_type<tc>, window_params = [{transform_indices = @transform_0, window_bounds = array<i64: 2, 8, 768>}, {transform_indices = @transform_1, window_bounds = array<i64: 2, 8, 768>}, {pipeline_mode = #tpu.pipeline_mode<synchronous>, transform_indices = @transform_2, window_bounds = array<i64: 768, 256>}, {pipeline_mode = #tpu.pipeline_mode<synchronous>, transform_indices = @transform_3, window_bounds = array<i64: 1, 256>}, {pipeline_mode = #tpu.pipeline_mode<synchronous>, transform_indices = @transform_4, window_bounds = array<i64: 256, 768>}, {pipeline_mode = #tpu.pipeline_mode<synchronous>, transform_indices = @transform_5, window_bounds = array<i64: 1, 768>}, {transform_indices = @transform_6, window_bounds = array<i64: 2, 768>}]} {
    %c0_i32 = arith.constant 0 : i32
    %0 = arith.cmpi eq, %arg1, %c0_i32 : i32
    %1 = arith.extui %0 : i1 to i32
    %c0_i32_0 = arith.constant 0 : i32
    %2 = arith.cmpi ne, %1, %c0_i32_0 : i32
    scf.if %2 {
      %cst_32 = arith.constant 0xFF800000 : f32
      %36 = vector.broadcast %cst_32 : f32 to vector<2x768xf32>
      %c0_33 = arith.constant 0 : index
      %c0_34 = arith.constant 0 : index
      %c0_35 = arith.constant 0 : index
      %37 = vector.load %arg9[%c0_33, %c0_34, %c0_35] : memref<4x2x768xf32, #tpu.memory_space<vmem>>, vector<1x2x768xf32>
      %38 = vector.shape_cast %37 : vector<1x2x768xf32> to vector<2x768xf32>
      %39 = vector.shape_cast %36 : vector<2x768xf32> to vector<1x2x768xf32>
      tpu.vector_store %arg9[%c0_33, %c0_34, %c0_35], %39 {strides = array<i32>} : memref<4x2x768xf32, #tpu.memory_space<vmem>>, vector<1x2x768xf32>,
      %cst_36 = arith.constant 0.000000e+00 : f32
      %40 = vector.broadcast %cst_36 : f32 to vector<2x768xf32>
      %c1_37 = arith.constant 1 : index
      %c0_38 = arith.constant 0 : index
      %c0_39 = arith.constant 0 : index
      %41 = vector.load %arg9[%c1_37, %c0_38, %c0_39] : memref<4x2x768xf32, #tpu.memory_space<vmem>>, vector<1x2x768xf32>
      %42 = vector.shape_cast %41 : vector<1x2x768xf32> to vector<2x768xf32>
      %43 = vector.shape_cast %40 : vector<2x768xf32> to vector<1x2x768xf32>
      tpu.vector_store %arg9[%c1_37, %c0_38, %c0_39], %43 {strides = array<i32>} : memref<4x2x768xf32, #tpu.memory_space<vmem>>, vector<1x2x768xf32>,
      %cst_40 = arith.constant 0xFF800000 : f32
      %44 = vector.broadcast %cst_40 : f32 to vector<2x768xf32>
      %c2_41 = arith.constant 2 : index
      %c0_42 = arith.constant 0 : index
      %c0_43 = arith.constant 0 : index
      %45 = vector.load %arg9[%c2_41, %c0_42, %c0_43] : memref<4x2x768xf32, #tpu.memory_space<vmem>>, vector<1x2x768xf32>
      %46 = vector.shape_cast %45 : vector<1x2x768xf32> to vector<2x768xf32>
      %47 = vector.shape_cast %44 : vector<2x768xf32> to vector<1x2x768xf32>
      tpu.vector_store %arg9[%c2_41, %c0_42, %c0_43], %47 {strides = array<i32>} : memref<4x2x768xf32, #tpu.memory_space<vmem>>, vector<1x2x768xf32>,
      %cst_44 = arith.constant 0.000000e+00 : f32
      %48 = vector.broadcast %cst_44 : f32 to vector<2x768xf32>
      %c3_45 = arith.constant 3 : index
      %c0_46 = arith.constant 0 : index
      %c0_47 = arith.constant 0 : index
      %49 = vector.load %arg9[%c3_45, %c0_46, %c0_47] : memref<4x2x768xf32, #tpu.memory_space<vmem>>, vector<1x2x768xf32>
      %50 = vector.shape_cast %49 : vector<1x2x768xf32> to vector<2x768xf32>
      %51 = vector.shape_cast %48 : vector<2x768xf32> to vector<1x2x768xf32>
      tpu.vector_store %arg9[%c3_45, %c0_46, %c0_47], %51 {strides = array<i32>} : memref<4x2x768xf32, #tpu.memory_space<vmem>>, vector<1x2x768xf32>,
    } else {
    }
    %c0 = arith.constant 0 : index
    %c0_1 = arith.constant 0 : index
    %c0_2 = arith.constant 0 : index
    %3 = vector.load %arg2[%c0, %c0_1, %c0_2] : memref<2x8x768xf32, #tpu.memory_space<vmem>>, vector<2x8x768xf32>
    %c0_3 = arith.constant 0 : index
    %c0_4 = arith.constant 0 : index
    %c0_5 = arith.constant 0 : index
    %4 = vector.load %arg9[%c0_3, %c0_4, %c0_5] : memref<4x2x768xf32, #tpu.memory_space<vmem>>, vector<1x2x768xf32>
    %5 = vector.shape_cast %4 : vector<1x2x768xf32> to vector<2x768xf32>
    %cst = arith.constant dense<0xFF800000> : vector<2x768xf32>
    %6 = vector.multi_reduction <maximumf>, %3, %cst [1] : vector<2x8x768xf32> to vector<2x768xf32>
    %7 = arith.maximumf %5, %6 : vector<2x768xf32>
    %c0_6 = arith.constant 0 : index
    %c0_7 = arith.constant 0 : index
    %c0_8 = arith.constant 0 : index
    %8 = vector.load %arg9[%c0_6, %c0_7, %c0_8] : memref<4x2x768xf32, #tpu.memory_space<vmem>>, vector<1x2x768xf32>
    %9 = vector.shape_cast %8 : vector<1x2x768xf32> to vector<2x768xf32>
    %10 = vector.shape_cast %7 : vector<2x768xf32> to vector<1x2x768xf32>
    tpu.vector_store %arg9[%c0_6, %c0_7, %c0_8], %10 {strides = array<i32>} : memref<4x2x768xf32, #tpu.memory_space<vmem>>, vector<1x2x768xf32>,
    %c1 = arith.constant 1 : index
    %c0_9 = arith.constant 0 : index
    %c0_10 = arith.constant 0 : index
    %11 = vector.load %arg9[%c1, %c0_9, %c0_10] : memref<4x2x768xf32, #tpu.memory_space<vmem>>, vector<1x2x768xf32>
    %12 = vector.shape_cast %11 : vector<1x2x768xf32> to vector<2x768xf32>
    %cst_11 = arith.constant dense<0.000000e+00> : vector<2x768xf32>
    %13 = vector.multi_reduction <add>, %3, %cst_11 [1] : vector<2x8x768xf32> to vector<2x768xf32>
    %14 = arith.addf %12, %13 : vector<2x768xf32>
    %c1_12 = arith.constant 1 : index
    %c0_13 = arith.constant 0 : index
    %c0_14 = arith.constant 0 : index
    %15 = vector.load %arg9[%c1_12, %c0_13, %c0_14] : memref<4x2x768xf32, #tpu.memory_space<vmem>>, vector<1x2x768xf32>
    %16 = vector.shape_cast %15 : vector<1x2x768xf32> to vector<2x768xf32>
    %17 = vector.shape_cast %14 : vector<2x768xf32> to vector<1x2x768xf32>
    tpu.vector_store %arg9[%c1_12, %c0_13, %c0_14], %17 {strides = array<i32>} : memref<4x2x768xf32, #tpu.memory_space<vmem>>, vector<1x2x768xf32>,
    %c0_15 = arith.constant 0 : index
    %c0_16 = arith.constant 0 : index
    %c0_17 = arith.constant 0 : index
    %18 = vector.load %arg3[%c0_15, %c0_16, %c0_17] : memref<2x8x768xf32, #tpu.memory_space<vmem>>, vector<2x8x768xf32>
    %c2 = arith.constant 2 : index
    %c0_18 = arith.constant 0 : index
    %c0_19 = arith.constant 0 : index
    %19 = vector.load %arg9[%c2, %c0_18, %c0_19] : memref<4x2x768xf32, #tpu.memory_space<vmem>>, vector<1x2x768xf32>
    %20 = vector.shape_cast %19 : vector<1x2x768xf32> to vector<2x768xf32>
    %cst_20 = arith.constant dense<0xFF800000> : vector<2x768xf32>
    %21 = vector.multi_reduction <maximumf>, %18, %cst_20 [1] : vector<2x8x768xf32> to vector<2x768xf32>
    %22 = arith.maximumf %20, %21 : vector<2x768xf32>
    %c2_21 = arith.constant 2 : index
    %c0_22 = arith.constant 0 : index
    %c0_23 = arith.constant 0 : index
    %23 = vector.load %arg9[%c2_21, %c0_22, %c0_23] : memref<4x2x768xf32, #tpu.memory_space<vmem>>, vector<1x2x768xf32>
    %24 = vector.shape_cast %23 : vector<1x2x768xf32> to vector<2x768xf32>
    %25 = vector.shape_cast %22 : vector<2x768xf32> to vector<1x2x768xf32>
    tpu.vector_store %arg9[%c2_21, %c0_22, %c0_23], %25 {strides = array<i32>} : memref<4x2x768xf32, #tpu.memory_space<vmem>>, vector<1x2x768xf32>,
    %c3 = arith.constant 3 : index
    %c0_24 = arith.constant 0 : index
    %c0_25 = arith.constant 0 : index
    %26 = vector.load %arg9[%c3, %c0_24, %c0_25] : memref<4x2x768xf32, #tpu.memory_space<vmem>>, vector<1x2x768xf32>
    %27 = vector.shape_cast %26 : vector<1x2x768xf32> to vector<2x768xf32>
    %cst_26 = arith.constant dense<0.000000e+00> : vector<2x768xf32>
    %28 = vector.multi_reduction <add>, %18, %cst_26 [1] : vector<2x8x768xf32> to vector<2x768xf32>
    %29 = arith.addf %27, %28 : vector<2x768xf32>
    %c3_27 = arith.constant 3 : index
    %c0_28 = arith.constant 0 : index
    %c0_29 = arith.constant 0 : index
    %30 = vector.load %arg9[%c3_27, %c0_28, %c0_29] : memref<4x2x768xf32, #tpu.memory_space<vmem>>, vector<1x2x768xf32>
    %31 = vector.shape_cast %30 : vector<1x2x768xf32> to vector<2x768xf32>
    %32 = vector.shape_cast %29 : vector<2x768xf32> to vector<1x2x768xf32>
    tpu.vector_store %arg9[%c3_27, %c0_28, %c0_29], %32 {strides = array<i32>} : memref<4x2x768xf32, #tpu.memory_space<vmem>>, vector<1x2x768xf32>,
    %c0_i32_30 = arith.constant 0 : i32
    %33 = arith.cmpi eq, %arg1, %c0_i32_30 : i32
    %34 = arith.extui %33 : i1 to i32
    %c0_i32_31 = arith.constant 0 : i32
    %35 = arith.cmpi ne, %34, %c0_i32_31 : i32
    scf.if %35 {
      %c0_32 = arith.constant 0 : index
      %c0_33 = arith.constant 0 : index
      %c0_34 = arith.constant 0 : index
      %36 = vector.load %arg9[%c0_32, %c0_33, %c0_34] : memref<4x2x768xf32, #tpu.memory_space<vmem>>, vector<1x2x768xf32>
      %37 = vector.shape_cast %36 : vector<1x2x768xf32> to vector<2x768xf32>
      %c1_35 = arith.constant 1 : index
      %c0_36 = arith.constant 0 : index
      %c0_37 = arith.constant 0 : index
      %38 = vector.load %arg9[%c1_35, %c0_36, %c0_37] : memref<4x2x768xf32, #tpu.memory_space<vmem>>, vector<1x2x768xf32>
      %39 = vector.shape_cast %38 : vector<1x2x768xf32> to vector<2x768xf32>
      %cst_38 = arith.constant 1.250000e-01 : f32
      %40 = vector.broadcast %cst_38 : f32 to vector<2x768xf32>
      %41 = arith.mulf %39, %40 : vector<2x768xf32>
      %c2_39 = arith.constant 2 : index
      %c0_40 = arith.constant 0 : index
      %c0_41 = arith.constant 0 : index
      %42 = vector.load %arg9[%c2_39, %c0_40, %c0_41] : memref<4x2x768xf32, #tpu.memory_space<vmem>>, vector<1x2x768xf32>
      %43 = vector.shape_cast %42 : vector<1x2x768xf32> to vector<2x768xf32>
      %c3_42 = arith.constant 3 : index
      %c0_43 = arith.constant 0 : index
      %c0_44 = arith.constant 0 : index
      %44 = vector.load %arg9[%c3_42, %c0_43, %c0_44] : memref<4x2x768xf32, #tpu.memory_space<vmem>>, vector<1x2x768xf32>
      %45 = vector.shape_cast %44 : vector<1x2x768xf32> to vector<2x768xf32>
      %cst_45 = arith.constant 1.250000e-01 : f32
      %46 = vector.broadcast %cst_45 : f32 to vector<2x768xf32>
      %47 = arith.mulf %45, %46 : vector<2x768xf32>
      %48 = tpu.concatenate %37, %41, %43, %47 in 0 : vector<2x768xf32>, vector<2x768xf32>, vector<2x768xf32>, vector<2x768xf32> -> vector<8x768xf32>
      %c0_46 = arith.constant 0 : index
      %c0_47 = arith.constant 0 : index
      %49 = vector.load %arg4[%c0_46, %c0_47] : memref<768x256xf32, #tpu.memory_space<vmem>>, vector<768x256xf32>
      %c0_48 = arith.constant 0 : index
      %c0_49 = arith.constant 0 : index
      %50 = vector.load %arg5[%c0_48, %c0_49] : memref<1x256xf32, #tpu.memory_space<vmem>>, vector<1x256xf32>
      %c0_50 = arith.constant 0 : index
      %c0_51 = arith.constant 0 : index
      %51 = vector.load %arg6[%c0_50, %c0_51] : memref<256x768xf32, #tpu.memory_space<vmem>>, vector<256x768xf32>
      %c0_52 = arith.constant 0 : index
      %c0_53 = arith.constant 0 : index
      %52 = vector.load %arg7[%c0_52, %c0_53] : memref<1x768xf32, #tpu.memory_space<vmem>>, vector<1x768xf32>
      %cst_54 = arith.constant dense<0.000000e+00> : vector<8x256xf32>
      %53 = tpu.matmul %48, %49, %cst_54 {dimension_numbers = #tpu.dot_dimension_numbers<[1], [0], [0], [1], [0, 0, 1, 1], [], []>} : vector<8x768xf32>, vector<768x256xf32>, vector<8x256xf32> -> vector<8x256xf32>
      %54 = vector.broadcast %50 : vector<1x256xf32> to vector<8x256xf32>
      %55 = arith.addf %53, %54 : vector<8x256xf32>
      %cst_55 = arith.constant 0.000000e+00 : f32
      %56 = vector.broadcast %cst_55 : f32 to vector<8x256xf32>
      %57 = arith.maximumf %55, %56 : vector<8x256xf32>
      %58 = vector.extract_strided_slice %57 {offsets = [0, 0], sizes = [2, 256], strides = [1, 1]} : vector<8x256xf32> to vector<2x256xf32>
      %59 = vector.extract_strided_slice %57 {offsets = [2, 0], sizes = [2, 256], strides = [1, 1]} : vector<8x256xf32> to vector<2x256xf32>
      %60 = arith.addf %58, %59 : vector<2x256xf32>
      %61 = vector.extract_strided_slice %57 {offsets = [4, 0], sizes = [2, 256], strides = [1, 1]} : vector<8x256xf32> to vector<2x256xf32>
      %62 = arith.addf %60, %61 : vector<2x256xf32>
      %63 = vector.extract_strided_slice %57 {offsets = [6, 0], sizes = [2, 256], strides = [1, 1]} : vector<8x256xf32> to vector<2x256xf32>
      %64 = arith.addf %62, %63 : vector<2x256xf32>
      %cst_56 = arith.constant dense<0.000000e+00> : vector<2x768xf32>
      %65 = tpu.matmul %64, %51, %cst_56 {dimension_numbers = #tpu.dot_dimension_numbers<[1], [0], [0], [1], [0, 0, 1, 1], [], []>} : vector<2x256xf32>, vector<256x768xf32>, vector<2x768xf32> -> vector<2x768xf32>
      %cst_57 = arith.constant 4.000000e+00 : f32
      %66 = vector.broadcast %cst_57 : f32 to vector<1x768xf32>
      %67 = arith.mulf %66, %52 : vector<1x768xf32>
      %68 = vector.broadcast %67 : vector<1x768xf32> to vector<2x768xf32>
      %69 = arith.addf %65, %68 : vector<2x768xf32>
      %70 = arith.negf %69 : vector<2x768xf32>
      %71 = math.exp %70 : vector<2x768xf32>
      %cst_58 = arith.constant 1.000000e+00 : f32
      %72 = vector.broadcast %cst_58 : f32 to vector<2x768xf32>
      %73 = arith.addf %72, %71 : vector<2x768xf32>
      %74 = arith.divf %72, %73 : vector<2x768xf32>
      %c0_59 = arith.constant 0 : index
      %c0_60 = arith.constant 0 : index
      %75 = vector.load %arg8[%c0_59, %c0_60] : memref<2x768xf32, #tpu.memory_space<vmem>>, vector<2x768xf32>
      tpu.vector_store %arg8[%c0_59, %c0_60], %74 {strides = array<i32>} : memref<2x768xf32, #tpu.memory_space<vmem>>, vector<2x768xf32>,
    } else {
    }
    return
  }
  func.func @transform_0(%arg0: i32, %arg1: i32) -> (i32, i32, i32) {
    %c0_i32 = arith.constant 0 : i32
    %c0_i32_0 = arith.constant 0 : i32
    return %arg0, %arg1, %c0_i32 : i32, i32, i32
  }
  func.func @transform_1(%arg0: i32, %arg1: i32) -> (i32, i32, i32) {
    %c0_i32 = arith.constant 0 : i32
    %c0_i32_0 = arith.constant 0 : i32
    return %arg0, %arg1, %c0_i32 : i32, i32, i32
  }
  func.func @transform_2(%arg0: i32, %arg1: i32) -> (i32, i32) {
    %c0_i32 = arith.constant 0 : i32
    %c0_i32_0 = arith.constant 0 : i32
    %c0_i32_1 = arith.constant 0 : i32
    return %c0_i32, %c0_i32_0 : i32, i32
  }
  func.func @transform_3(%arg0: i32, %arg1: i32) -> (i32, i32) {
    %c0_i32 = arith.constant 0 : i32
    %c0_i32_0 = arith.constant 0 : i32
    %c0_i32_1 = arith.constant 0 : i32
    return %c0_i32, %c0_i32_0 : i32, i32
  }
  func.func @transform_4(%arg0: i32, %arg1: i32) -> (i32, i32) {
    %c0_i32 = arith.constant 0 : i32
    %c0_i32_0 = arith.constant 0 : i32
    %c0_i32_1 = arith.constant 0 : i32
    return %c0_i32, %c0_i32_0 : i32, i32
  }
  func.func @transform_5(%arg0: i32, %arg1: i32) -> (i32, i32) {
    %c0_i32 = arith.constant 0 : i32
    %c0_i32_0 = arith.constant 0 : i32
    %c0_i32_1 = arith.constant 0 : i32
    return %c0_i32, %c0_i32_0 : i32, i32
  }
  func.func @transform_6(%arg0: i32, %arg1: i32) -> (i32, i32) {
    %c0_i32 = arith.constant 0 : i32
    %c0_i32_0 = arith.constant 0 : i32
    return %arg0, %c0_i32 : i32, i32
  }
}

</mosaic_0001>

<bundles_post_ra>
// kernel: tpu_custom_call.1
= control target key start
LH: loop header
LB: loop body
LE: loop exit
PB: predicated region body
PF: predicated region fallthrough
CT: control target
= control target key end

     0   :  { %11 = vsyncpa [#allocation4], 0  ;;  %s3199_s0 = inlined_call_operand.hbm [shape: f32[2,8,768], index: 0, kind: input, shape index: {}]   ;;  %s3200_s1 = inlined_call_operand.hbm [shape: f32[2,8,768], index: 1, kind: input, shape index: {}]   ;;  %s3201_s2 = inlined_call_operand.hbm [shape: f32[768,256], index: 2, kind: input, shape index: {}]   ;;  %s3202_s3 = inlined_call_operand.vmem [shape: f32[1,256], index: 3, kind: input, shape index: {}]   ;;  %s3203_s4 = inlined_call_operand.hbm [shape: f32[256,768], index: 4, kind: input, shape index: {}]   ;;  %s3204_s5 = inlined_call_operand.vmem [shape: f32[1,768], index: 5, kind: input, shape index: {}]   ;;  %s3205_s6 = inlined_call_operand.hbm [shape: f32[2,768], index: 6, kind: output, shape index: {}]  }
   0x1   :  { %12 = vsyncpa [#allocation7], 0 }
   0x2   :  { %13 = vsyncpa [#allocation10], 0 }
   0x3   :  { %14 = vsyncpa [#allocation5], 0  ;;  %s2439_s21 = smov [#allocation6]   ;;  %s2440_s23 = smov [#allocation3]  }
   0x4   :  { %s32_s22 = sshll.u32 %s2439_s21, 4  ;;  %s20_s24 = sshll.u32 %s2440_s23, 4  ;;  %s33_s22 = int_to_ptr.vmem [resolvable:$true] %s32_s22  ;;  %s2486_s24 = int_to_ptr.vmem [resolvable:$true] %s20_s24 }
   0x5   :  { %s2321_s27 = scalar_lea.hbm %s3200_s1, 1536 }
   0x6   :  { %p2322_p0 = scmp.ne.s32.totalorder %s3200_s1, %s2321_s27  ;;  %p2325_p1 = scmp.lt.u32.totalorder %s2321_s27, %s3200_s1 }
   0x8   :  { %p2327_p2 = pnand %p2325_p1, %p2322_p0 }
   0xa   :  { %2330 = shalt.err (!%p2327_p2)
}
   0xb   :  { %s2331_s8 = scalar_lea.vmem %s33_s22, 1536  ;;  %p2336_p4 = scmp.lt.s32.totalorder %s33_s22, %s33_s22 }
   0xc   :  { %p2332_p3 = scmp.ne.s32.totalorder %s33_s22, %s2331_s8  ;;  %p2337_p5 = scmp.lt.s32.totalorder %s2331_s8, %s2331_s8 }
   0xe   :  { %p2338_p6 = por %p2337_p5, %p2336_p4 }
  0x10   :  { %p2339_p7 = pnand %p2338_p6, %p2332_p3 }
  0x12   :  { %2342 = shalt.err (!%p2339_p7)
}
  0x13   :  { %s2441_s9 = smov 768   ;;  %s2442_s10 = smov 48  }
  0x14   :  { %38 = dma.hbm_to_vmem [thread:$0]  %s3200_s1, 1536, %s33_s22, [#allocation7], %s2441_s9, %s2441_s9, %s2442_s10  }
  0x15   :  { %s2343_s15 = scalar_lea.hbm %s3199_s0, 1536 }
  0x16   :  { %p2344_p8 = scmp.ne.s32.totalorder %s3199_s0, %s2343_s15  ;;  %p2347_p9 = scmp.lt.u32.totalorder %s2343_s15, %s3199_s0 }
  0x18   :  { %p2349_p10 = pnand %p2347_p9, %p2344_p8 }
  0x1a   :  { %2352 = shalt.err (!%p2349_p10)
}
  0x1b   :  { %s2353_s20 = scalar_lea.vmem %s2486_s24, 1536  ;;  %p2358_p12 = scmp.lt.s32.totalorder %s2486_s24, %s2486_s24 }
  0x1c   :  { %p2354_p11 = scmp.ne.s32.totalorder %s2486_s24, %s2353_s20  ;;  %p2359_p13 = scmp.lt.s32.totalorder %s2353_s20, %s2353_s20 }
  0x1e   :  { %p2360_p0 = por %p2359_p13, %p2358_p12 }
  0x20   :  { %p2361_p1 = pnand %p2360_p0, %p2354_p11 }
  0x22   :  { %2364 = shalt.err (!%p2361_p1)
}
  0x23   :  { %26 = dma.hbm_to_vmem [thread:$0]  %s3199_s0, 1536, %s2486_s24, [#allocation4], %s2441_s9, %s2441_s9, %s2442_s10  }
  0x24   :  { %s2443_s22 = smov [#allocation8]   ;;  %s2365_s27 = scalar_lea.hbm %s3201_s2, 24576 }
  0x25   :  { %s44_s23 = sshll.u32 %s2443_s22, 4  ;;  %p2366_p2 = scmp.ne.s32.totalorder %s3201_s2, %s2365_s27  ;;  %s45_s23 = int_to_ptr.vmem [resolvable:$true] %s44_s23 }
  0x26   :  { %p2369_p3 = scmp.lt.u32.totalorder %s2365_s27, %s3201_s2 }
  0x28   :  { %p2371_p4 = pnand %p2369_p3, %p2366_p2 }
  0x2a   :  { %2374 = shalt.err (!%p2371_p4)
}
  0x2b   :  { %s2375_s8 = scalar_lea.vmem %s45_s23, 24576  ;;  %p2380_p6 = scmp.lt.s32.totalorder %s45_s23, %s45_s23 }
  0x2c   :  { %p2376_p5 = scmp.ne.s32.totalorder %s45_s23, %s2375_s8  ;;  %p2381_p7 = scmp.lt.s32.totalorder %s2375_s8, %s2375_s8 }
  0x2e   :  { %p2382_p8 = por %p2381_p7, %p2380_p6 }
  0x30   :  { %p2383_p9 = pnand %p2382_p8, %p2376_p5 }
  0x32   :  { %2386 = shalt.err (!%p2383_p9)
}
  0x33   :  { %s2444_s0 = smov 256   ;;  %s2445_s24 = smov 16  }
  0x34   :  { %50 = dma.hbm_to_vmem [thread:$0]  %s3201_s2, 24576, %s45_s23, [#allocation7], %s2444_s0, %s2444_s0, %s2445_s24  }
  0x35   :  { %s2446_s13 = smov [#allocation9]   ;;  %s2387_s17 = scalar_lea.hbm %s3203_s4, 24576 }
  0x36   :  { %s58_s14 = sshll.u32 %s2446_s13, 4  ;;  %p2388_p10 = scmp.ne.s32.totalorder %s3203_s4, %s2387_s17  ;;  %s59_s14 = int_to_ptr.vmem [resolvable:$true] %s58_s14 }
  0x37   :  { %p2391_p11 = scmp.lt.u32.totalorder %s2387_s17, %s3203_s4 }
  0x39   :  { %p2393_p12 = pnand %p2391_p11, %p2388_p10 }
  0x3b   :  { %2396 = shalt.err (!%p2393_p12)
}
  0x3c   :  { %s2397_s21 = scalar_lea.vmem %s59_s14, 24576  ;;  %p2402_p0 = scmp.lt.s32.totalorder %s59_s14, %s59_s14 }
  0x3d   :  { %p2398_p13 = scmp.ne.s32.totalorder %s59_s14, %s2397_s21  ;;  %p2403_p1 = scmp.lt.s32.totalorder %s2397_s21, %s2397_s21 }
  0x3f   :  { %p2404_p2 = por %p2403_p1, %p2402_p0 }
  0x41   :  { %p2405_p3 = pnand %p2404_p2, %p2398_p13 }
  0x43   :  { %2408 = shalt.err (!%p2405_p3)
}
  0x44   :  { %64 = dma.hbm_to_vmem [thread:$0]  %s3203_s4, 24576, %s59_s14, [#allocation10], %s2441_s9, %s2441_s9, %s2442_s10  }
  0x45   :  { %2431 = dma.done.wait [#allocation4], 1536  }
  0x46   :  { %2432 = vsyncadd [#allocation4], 4294965760 }
  0x47   :  { %2433 = dma.done.wait [#allocation7], 26112  }
  0x48   :  { %2434 = vsyncadd [#allocation7], 4294941184 }
  0x49   :  { %2435 = dma.done.wait [#allocation10], 24576  }
  0x4a   :  { %2436 = vsyncadd [#allocation10], 4294942720  ;;  %v2447_v0 = vmov -inf   ;;  %v2448_v1 = vmov 0.0   ;;  %v922_v2 = vld [vmem:[#allocation8 + $0x8] sm:$0xff]  ;;  %v924_v3 = vld [vmem:[#allocation8 + $0x18] sm:$0xff]  ;;  %v197_v27 = vlaneseq }
  0x4b   :  { %84 = vst [vmem:[#allocation2 + $0x8] sm:$0xf] %v2447_v0  ;;  %87 = vst [vmem:[#allocation2 + $0x14] sm:$0xf] %v2448_v1  ;;  %v921_v4 = vld [vmem:[#allocation8] sm:$0xff]  ;;  %v1895_v5 = vpack.c.bf16 %v924_v3, %v922_v2  ;;  %v923_v6 = vld [vmem:[#allocation8 + $0x10] sm:$0xff] }
  0x4c   :  { %90 = vst [vmem:[#allocation2 + $0x20] sm:$0xf] %v2447_v0  ;;  %93 = vst [vmem:[#allocation2 + $0x2c] sm:$0xf] %v2448_v1  ;;  %v926_v7 = vld [vmem:[#allocation8 + $0x28] sm:$0xff]  ;;  %v928_v8 = vld [vmem:[#allocation8 + $0x38] sm:$0xff]  ;;  %v1897_v9 = vpack.c.bf16 %v923_v6, %v921_v4 }
  0x4d   :  { %v1899_v10 = vpack.c.bf16 %v928_v8, %v926_v7  ;;  %v925_v11 = vld [vmem:[#allocation8 + $0x20] sm:$0xff]  ;;  %v927_v12 = vld [vmem:[#allocation8 + $0x30] sm:$0xff]  ;;  %v930_v13 = vld [vmem:[#allocation8 + $0x48] sm:$0xff]  ;;  %1896 = vmatprep.subr.bf16.mxu0 %v1895_v5  ;;  %v2449_v25 = vmov 1983009808   ;;  %v2580_v49 = vshrl.u32 %v197_v27, 7 }
  0x4e   :  { %v932_v14 = vld [vmem:[#allocation8 + $0x58] sm:$0xff]  ;;  %1898 = vmatpush1.bf16.msra.mxu0 %v1897_v9  ;;  %v1901_v15 = vpack.c.bf16 %v927_v12, %v925_v11  ;;  %v929_v17 = vld [vmem:[#allocation8 + $0x40] sm:$0xff]  ;;  %v931_v18 = vld [vmem:[#allocation8 + $0x50] sm:$0xff]  ;;  %v195_v26 = vunpack.c.l.s4 %v2449_v25  ;;  %vm247_vm0 = vcmask 1041409   ;;  %vm249_vm1 = vcmask 1043459  }
  0x4f   :  { %1900 = vmatprep.subr.bf16.mxu0 %v1899_v10  ;;  %v1903_v16 = vpack.c.bf16 %v932_v14, %v930_v13  ;;  %v934_v19 = vld [vmem:[#allocation8 + $0x68] sm:$0xff]  ;;  %v936_v20 = vld [vmem:[#allocation8 + $0x78] sm:$0xff]  ;;  %v1905_v21 = vpack.c.bf16 %v931_v18, %v929_v17  ;;  %v933_v23 = vld [vmem:[#allocation8 + $0x60] sm:$0xff]  ;;  %3227 = vst [vmem:[#allocation16_spill] sm:$0xff] %v2580_v49  ;;  %vm251_vm2 = vcmask 1045509   ;;  %vm253_vm3 = vcmask 1047559  }
  0x50   :  { %v1907_v22 = vpack.c.bf16 %v936_v20, %v934_v19  ;;  %v935_v24 = vld [vmem:[#allocation8 + $0x70] sm:$0xff]  ;;  %v938_v28 = vld [vmem:[#allocation8 + $0x88] sm:$0xff]  ;;  %v940_v29 = vld [vmem:[#allocation8 + $0x98] sm:$0xff]  ;;  %v196_v48 = vunpack.c.0.s8 %v195_v26  ;;  %vm900_vm4 = vcmask 1041408   ;;  %vm907_vm5 = vcmask 1043456  }
  0x51   :  { %v2550_v30 = vld [vmem:[#allocation8 + $0x80] sm:$0xff]  ;;  %v939_v31 = vld [vmem:[#allocation8 + $0x90] sm:$0xff]  ;;  %v1909_v32 = vpack.c.bf16 %v935_v24, %v933_v23  ;;  %v2552_v33 = vld [vmem:[#allocation8 + $0xa8] sm:$0xff]  ;;  %v1911_v39 = vpack.c.bf16 %v940_v29, %v938_v28  ;;  %vm914_vm6 = vcmask 1045504  }
  0x52   :  { %1902 = vmatpush1.bf16.msra.mxu0 %v1901_v15  ;;  %v2554_v34 = vld [vmem:[#allocation8 + $0xb8] sm:$0xff]  ;;  %v2556_v35 = vld [vmem:[#allocation8 + $0xa0] sm:$0xff]  ;;  %v2558_v36 = vld [vmem:[#allocation8 + $0xb0] sm:$0xff]  ;;  %v1913_v0 = vpack.c.bf16 %v939_v31, %v2550_v30  ;;  %v2630_v10 = vsub.s32 %v196_v48, %v2580_v49 }
  0x53   :  { %1904 = vmatprep.subr.bf16.mxu0 %v1903_v16  ;;  %v2560_v37 = vld [vmem:[#allocation8 + $0xc8] sm:$0xff]  ;;  %v2562_v38 = vld [vmem:[#allocation8 + $0xd8] sm:$0xff]  ;;  %v2564_v40 = vld [vmem:[#allocation8 + $0xc0] sm:$0xff]  ;;  %v1915_v4 = vpack.c.bf16 %v2554_v34, %v2552_v33  ;;  %v1917_v5 = vpack.c.bf16 %v2558_v36, %v2556_v35 }
  0x54   :  { %v2566_v41 = vld [vmem:[#allocation8 + $0xd0] sm:$0xff]  ;;  %v2568_v42 = vld [vmem:[#allocation8 + $0xe8] sm:$0xff]  ;;  %v2570_v43 = vld [vmem:[#allocation8 + $0xf8] sm:$0xff]  ;;  %v1919_v6 = vpack.c.bf16 %v2562_v38, %v2560_v37 }
  0x55   :  { %v2572_v44 = vld [vmem:[#allocation8 + $0xe0] sm:$0xff]  ;;  %v2574_v45 = vld [vmem:[#allocation8 + $0xf0] sm:$0xff]  ;;  %v2576_v46 = vld [vmem:[#allocation8 + $0x108] sm:$0xff]  ;;  %v1921_v11 = vpack.c.bf16 %v2566_v41, %v2564_v40 }
  0x56   :  { %1906 = vmatpush1.bf16.msra.mxu0 %v1905_v21  ;;  %v2578_v47 = vld [vmem:[#allocation8 + $0x118] sm:$0xff]  ;;  %v2582_v50 = vld [vmem:[#allocation8 + $0x100] sm:$0xff]  ;;  %v2584_v51 = vld [vmem:[#allocation8 + $0x110] sm:$0xff] }
  0x57   :  { %1908 = vmatprep.subr.bf16.mxu0 %v1907_v22  ;;  %v2586_v52 = vld [vmem:[#allocation8 + $0x128] sm:$0xff]  ;;  %v2588_v53 = vld [vmem:[#allocation8 + $0x138] sm:$0xff]  ;;  %v2590_v54 = vld [vmem:[#allocation8 + $0x120] sm:$0xff] }
  0x58   :  { %v2592_v55 = vld [vmem:[#allocation8 + $0x130] sm:$0xff]  ;;  %v2594_v56 = vld [vmem:[#allocation8 + $0x148] sm:$0xff]  ;;  %v2596_v57 = vld [vmem:[#allocation8 + $0x158] sm:$0xff] }
  0x59   :  { %v2598_v58 = vld [vmem:[#allocation8 + $0x140] sm:$0xff]  ;;  %v2600_v59 = vld [vmem:[#allocation8 + $0x150] sm:$0xff]  ;;  %v2602_v60 = vld [vmem:[#allocation8 + $0x168] sm:$0xff] }
  0x5a   :  { %v2604_v61 = vld [vmem:[#allocation8 + $0x178] sm:$0xff]  ;;  %v2606_v62 = vld [vmem:[#allocation8 + $0x160] sm:$0xff]  ;;  %v2608_v63 = vld [vmem:[#allocation8 + $0x170] sm:$0xff]  ;;  %1910 = vmatpush1.bf16.msra.mxu0 %v1909_v32 }
  0x5b   :  { %v2611_v1 = vld [vmem:[#allocation8 + $0x188] sm:$0xff]  ;;  %v2613_v2 = vld [vmem:[#allocation8 + $0x198] sm:$0xff]  ;;  %v2615_v3 = vld [vmem:[#allocation8 + $0x180] sm:$0xff]  ;;  %1912 = vmatprep.subr.bf16.mxu0 %v1911_v39 }
  0x5c   :  { %3228 = vst [vmem:[#allocation17_spill] sm:$0xff] %v2611_v1  ;;  %3229 = vst [vmem:[#allocation18_spill] sm:$0xff] %v2615_v3  ;;  %v2623_v7 = vld [vmem:[#allocation8 + $0x190] sm:$0xff]  ;;  %v2625_v8 = vld [vmem:[#allocation8 + $0x1a8] sm:$0xff] }
  0x5d   :  { %3230 = vst [vmem:[#allocation19_spill] sm:$0xff] %v2623_v7  ;;  %3231 = vst [vmem:[#allocation20_spill] sm:$0xff] %v2625_v8  ;;  %v2627_v9 = vld [vmem:[#allocation8 + $0x1b8] sm:$0xff]  ;;  %v2640_v15 = vld [vmem:[#allocation8 + $0x1a0] sm:$0xff] }
  0x5e   :  { %3232 = vst [vmem:[#allocation21_spill] sm:$0xff] %v2627_v9  ;;  %3233 = vst [vmem:[#allocation22_spill] sm:$0xff] %v2640_v15  ;;  %v2642_v16 = vld [vmem:[#allocation8 + $0x1b0] sm:$0xff]  ;;  %v2644_v17 = vld [vmem:[#allocation8 + $0x1c8] sm:$0xff]  ;;  %1914 = vmatpush1.bf16.msra.mxu0 %v1913_v0 }
  0x5f   :  { %3234 = vst [vmem:[#allocation23_spill] sm:$0xff] %v2642_v16  ;;  %3235 = vst [vmem:[#allocation24_spill] sm:$0xff] %v2644_v17  ;;  %v2654_v22 = vld [vmem:[#allocation8 + $0x1d8] sm:$0xff]  ;;  %v2656_v23 = vld [vmem:[#allocation8 + $0x1c0] sm:$0xff]  ;;  %1916 = vmatprep.subr.bf16.mxu0 %v1915_v4  ;;  %v3243_v17 = vpack.c.bf16 %v2570_v43, %v2568_v42 }
  0x60   :  { %3236 = vst [vmem:[#allocation25_spill] sm:$0xff] %v2654_v22  ;;  %3237 = vst [vmem:[#allocation26_spill] sm:$0xff] %v2656_v23  ;;  %v2658_v24 = vld [vmem:[#allocation8 + $0x1d0] sm:$0xff]  ;;  %v2668_v29 = vld [vmem:[#allocation8 + $0x1e8] sm:$0xff] }
  0x61   :  { %3238 = vst [vmem:[#allocation27_spill] sm:$0xff] %v2658_v24  ;;  %3239 = vst [vmem:[#allocation28_spill] sm:$0xff] %v2668_v29  ;;  %v2670_v30 = vld [vmem:[#allocation8 + $0x1f8] sm:$0xff]  ;;  %v2672_v31 = vld [vmem:[#allocation8 + $0x1e0] sm:$0xff] }
  0x62   :  { %3240 = vst [vmem:[#allocation29_spill] sm:$0xff] %v2670_v30  ;;  %3241 = vst [vmem:[#allocation30_spill] sm:$0xff] %v2672_v31  ;;  %v2682_v36 = vld [vmem:[#allocation8 + $0x1f0] sm:$0xff]  ;;  %v2684_v37 = vld [vmem:[#allocation3] sm:$0xff]  ;;  %1918 = vmatpush1.bf16.msra.mxu0 %v1917_v5 }
  0x63   :  { %3242 = vst [vmem:[#allocation31_spill] sm:$0xff] %v2682_v36  ;;  %v2686_v38 = vld [vmem:[#allocation3 + $0x8] sm:$0xff]  ;;  %v2692_v41 = vld [vmem:[#allocation3 + $0x10] sm:$0xff]  ;;  %v2694_v48 = vld [vmem:[#allocation3 + $0x18] sm:$0xff]  ;;  %v108_v4 = vrot.slane %v2684_v37, 4  ;;  %1920 = vmatprep.subr.bf16.mxu0 %v1919_v6 }
  0x64   :  { %v2696_v0 = vld [vmem:[#allocation3 + $0x30] sm:$0xff]  ;;  %v114_v35 = vrot.slane %v2686_v38, 4  ;;  %v2702_v33 = vld [vmem:[#allocation3 + $0x38] sm:$0xff]  ;;  %v2704_v32 = vld [vmem:[#allocation3 + $0x40] sm:$0xff]  ;;  %v120_v40 = vrot.slane %v2692_v41, 4  ;;  %v126_v28 = vrot.slane %v2694_v48, 4 }
  0x65   :  { %v2706_v39 = vld [vmem:[#allocation3 + $0x48] sm:$0xff]  ;;  %v3211_v27 = vrot.slane %v2696_v0, 4  ;;  %v109_v26 = vmax.f32 %v2684_v37, %v108_v4  ;;  %v3216_v21 = vrot.slane %v2702_v33, 4  ;;  %v3219_v34 = vrot.slane %v2704_v32, 4 }
  0x66   :  { %v115_v25 = vmax.f32 %v2686_v38, %v114_v35  ;;  %v121_v20 = vmax.f32 %v2692_v41, %v120_v40  ;;  %v127_v19 = vmax.f32 %v2694_v48, %v126_v28  ;;  %v3226_v14 = vrot.slane %v2706_v39, 4  ;;  %1922 = vmatpush1.bf16.msra.mxu0 %v1921_v11 }
  0x67   :  { %v145_v18 = vmax.f32 %v2696_v0, %v3211_v27  ;;  %v110_v5 = vrot.slane %v109_v26, 2  ;;  %v151_v12 = vmax.f32 %v2702_v33, %v3216_v21  ;;  %v157_v6 = vmax.f32 %v2704_v32, %v3219_v34  ;;  %1924 = vmatprep.subr.bf16.mxu0 %v3243_v17 }
  0x68   :  { %v116_v13 = vrot.slane %v115_v25, 2  ;;  %v122_v49 = vrot.slane %v121_v20, 2  ;;  %v128_v31 = vrot.slane %v127_v19, 2  ;;  %v163_v29 = vmax.f32 %v2706_v39, %v3226_v14 }
  0x69   :  { %v146_v36 = vrot.slane %v145_v18, 2  ;;  %v111_v27 = vmax.f32 %v109_v26, %v110_v5  ;;  %v152_v23 = vrot.slane %v151_v12, 2  ;;  %v158_v24 = vrot.slane %v157_v6, 2 }
  0x6a   :  { %v117_v30 = vmax.f32 %v115_v25, %v116_v13  ;;  %v123_v21 = vmax.f32 %v121_v20, %v122_v49  ;;  %v129_v22 = vmax.f32 %v127_v19, %v128_v31  ;;  %v164_v34 = vrot.slane %v163_v29, 2 }
  0x6b   :  { %v147_v15 = vmax.f32 %v145_v18, %v146_v36  ;;  %v112_v16 = vrot.slane %v111_v27, 1  ;;  %v153_v9 = vmax.f32 %v151_v12, %v152_v23  ;;  %v159_v3 = vmax.f32 %v157_v6, %v158_v24 }
  0x6c   :  { %v118_v8 = vrot.slane %v117_v30, 1  ;;  %v124_v7 = vrot.slane %v123_v21, 1  ;;  %v130_v1 = vrot.slane %v129_v22, 1  ;;  %v165_v11 = vmax.f32 %v163_v29, %v164_v34 }
  0x6d   :  { %v148_v14 = vrot.slane %v147_v15, 1  ;;  %v3244_v13 = vpack.c.bf16 %v2574_v45, %v2572_v44  ;;  %v113_v25 = vmax.f32 %v111_v27, %v112_v16  ;;  %v154_v42 = vrot.slane %v153_v9, 1 }
  0x6e   :  { %v119_v26 = vmax.f32 %v117_v30, %v118_v8  ;;  %v160_v43 = vrot.slane %v159_v3, 1  ;;  %v3245_v49 = vpack.c.bf16 %v2578_v47, %v2576_v46  ;;  %v125_v17 = vmax.f32 %v123_v21, %v124_v7 }
  0x6f   :  { %1926 = vmatpush1.bf16.msra.mxu0 %v3244_v13  ;;  %v131_v18 = vmax.f32 %v129_v22, %v130_v1  ;;  %v149_v12 = vmax.f32 %v147_v15, %v148_v14  ;;  %v166_v19 = vrot.slane %v165_v11, 1  ;;  %v155_v20 = vmax.f32 %v153_v9, %v154_v42 }
  0x70   :  { %1928 = vmatprep.subr.bf16.mxu0 %v3245_v49  ;;  %v161_v23 = vmax.f32 %v159_v3, %v160_v43  ;;  %v192_v24 = vcombine.low %v113_v25, %v119_v26  ;;  %v272_v29 = vadd.f32 %v108_v4, %v2684_v37  ;;  %v278_v45 = vadd.f32 %v114_v35, %v2686_v38  ;;  %v2768_v26 = vld [vmem:[#allocation6] sm:$0xff] }
  0x71   :  { %v167_v31 = vmax.f32 %v165_v11, %v166_v19  ;;  %v193_v44 = vcombine.low %v125_v17, %v131_v18  ;;  %v284_v8 = vadd.f32 %v120_v40, %v2692_v41  ;;  %v3246_v16 = vpack.c.bf16 %v2584_v51, %v2582_v50 }
  0x72   :  { %v200_v46 = vrot.slane %v192_v24, %v2630_v10  ;;  %v217_v47 = vcombine.low %v149_v12, %v155_v20  ;;  %v273_v1 = vrot.slane %v272_v29, 2  ;;  %v290_v3 = vadd.f32 %v126_v28, %v2694_v48 }
  0x73   :  { %1930 = vmatpush1.bf16.msra.mxu0 %v3246_v16  ;;  %v3247_v7 = vpack.c.bf16 %v2588_v53, %v2586_v52  ;;  %v207_v9 = vrot.slane %v193_v44, %v2630_v10  ;;  %v218_v14 = vcombine.low %v161_v23, %v167_v31  ;;  %v279_v15 = vrot.slane %v278_v45, 2 }
  0x74   :  { %v285_v21 = vrot.slane %v284_v8, 2  ;;  %v225_v50 = vrot.slane %v217_v47, %v2630_v10  ;;  %v274_v51 = vadd.f32 %v273_v1, %v272_v29  ;;  %v291_v22 = vrot.slane %v290_v3, 2 }
  0x75   :  { %1932 = vmatprep.subr.bf16.mxu0 %v3247_v7  ;;  %v3248_v27 = vrot.slane %v2696_v0, 4  ;;  %v208_v28 = vcombine.low %v200_v46, %v207_v9  ;;  %v232_v34 = vrot.slane %v218_v14, %v2630_v10  ;;  %v280_v52 = vadd.f32 %v279_v15, %v278_v45  ;;  %v2782_v45 = vld [vmem:[#allocation6 + $0x8] sm:$0xff]  ;;  %v2796_v7 = vld [vmem:[#allocation6 + $0x18] sm:$0xff]  ;;  %v2798_v9 = vld [vmem:[#allocation6 + $0x30] sm:$0xff] }
  0x76   :  { %v286_v53 = vadd.f32 %v285_v21, %v284_v8  ;;  %v3249_v35 = vpack.c.bf16 %v2592_v55, %v2590_v54  ;;  %v275_v36 = vrot.slane %v274_v51, 1  ;;  %v292_v37 = vadd.f32 %v291_v22, %v290_v3  ;;  %v3257_v15 = vld [vmem:[#allocation17_spill] sm:$0xff] }
  0x77   :  { %v308_v30 = vadd.f32 %v3248_v27, %v2696_v0  ;;  %v3250_v40 = vrot.slane %v2702_v33, 4  ;;  %v3251_v48 = vpack.c.bf16 %v2596_v57, %v2594_v56  ;;  %v233_v0 = vcombine.low %v225_v50, %v232_v34  ;;  %v2808_v27 = vld [vmem:[#allocation6 + $0x38] sm:$0xff] }
  0x78   :  { %1934 = vmatpush1.bf16.msra.mxu0 %v3249_v35  ;;  %v281_v4 = vrot.slane %v280_v52, 1  ;;  %v287_v5 = vrot.slane %v286_v53, 1  ;;  %v3252_v6 = vrot.slane %v2704_v32, 4  ;;  %v276_v54 = vadd.f32 %v275_v36, %v274_v51  ;;  %v3259_v36 = vld [vmem:[#allocation19_spill] sm:$0xff] }
  0x79   :  { %v309_v38 = vrot.slane %v308_v30, 2  ;;  %v314_v41 = vadd.f32 %v3250_v40, %v2702_v33  ;;  %1936 = vmatprep.subr.bf16.mxu0 %v3251_v48  ;;  %v293_v55 = vrot.slane %v292_v37, 1  ;;  %v246_v42 = vrot.slane %v233_v0, 7 }
  0x7a   :  { %v320_v11 = vadd.f32 %v3252_v6, %v2704_v32  ;;  %v282_v43 = vadd.f32 %v281_v4, %v280_v52  ;;  %v288_v33 = vadd.f32 %v287_v5, %v286_v53  ;;  %v3253_v56 = vpack.c.bf16 %v2600_v59, %v2598_v58  ;;  %v2812_v52 = vld [vmem:[#allocation6 + $0x40] sm:$0xff]  ;;  %v3262_v4 = vld [vmem:[#allocation21_spill] sm:$0xff]  ;;  %v3263_v5 = vld [vmem:[#allocation20_spill] sm:$0xff] }
  0x7b   :  { %v310_v13 = vadd.f32 %v309_v38, %v308_v30  ;;  %v315_v25 = vrot.slane %v314_v41, 2  ;;  %v294_v57 = vadd.f32 %v293_v55, %v292_v37  ;;  %v3254_v32 = vrot.slane %v2706_v39, 4  ;;  %v3260_v37 = vld [vmem:[#allocation18_spill] sm:$0xff] }
  0x7c   :  { %v321_v49 = vrot.slane %v320_v11, 2  ;;  %1938 = vmatpush1.bf16.msra.mxu0 %v3253_v56  ;;  %v3255_v19 = vpack.c.bf16 %v2604_v61, %v2602_v60  ;;  %v248_v20 = vsel %vm247_vm0, %v246_v42, %v208_v28  ;;  %v355_v24 = vcombine.low %v276_v54, %v282_v43  ;;  %v2788_v61 = vld [vmem:[#allocation6 + $0x10] sm:$0xff] }
  0x7d   :  { %v311_v17 = vrot.slane %v310_v13, 1  ;;  %v316_v18 = vadd.f32 %v315_v25, %v314_v41  ;;  %v326_v12 = vadd.f32 %v3254_v32, %v2706_v39  ;;  %v440_v29 = vrot.slane %v2768_v26, 4  ;;  %v3265_v32 = vld [vmem:[#allocation23_spill] sm:$0xff] }
  0x7e   :  { %1940 = vmatprep.subr.bf16.mxu0 %v3255_v19  ;;  %v322_v23 = vadd.f32 %v321_v49, %v320_v11  ;;  %v250_v58 = vsel %vm249_vm1, %v246_v42, %v248_v20  ;;  %v356_v16 = vcombine.low %v288_v33, %v294_v57  ;;  %v2786_v60 = vrot.slane %v355_v24, %v2630_v10  ;;  %v2837_v49 = vld [vmem:[#allocation6 + $0x48] sm:$0xff] }
  0x7f   :  { %v312_v59 = vadd.f32 %v311_v17, %v310_v13  ;;  %v317_v31 = vrot.slane %v316_v18, 1  ;;  %v327_v44 = vrot.slane %v326_v12, 2  ;;  %v252_v8 = vsel %vm251_vm2, %v246_v42, %v250_v58 }
  0x80   :  { %v323_v39 = vrot.slane %v322_v23, 1  ;;  %v3256_v46 = vpack.c.bf16 %v2608_v63, %v2606_v62  ;;  %v2794_v47 = vsel %vm253_vm3, %v246_v42, %v252_v8  ;;  %v441_v14 = vmax.f32 %v2768_v26, %v440_v29 }
  0x81   :  { %v318_v1 = vadd.f32 %v317_v31, %v316_v18  ;;  %v328_v3 = vadd.f32 %v327_v44, %v326_v12  ;;  %v3258_v21 = vpack.c.bf16 %v2613_v2, %v3257_v15  ;;  %v370_v62 = vrot.slane %v356_v16, %v2630_v10  ;;  %v3266_v12 = vld [vmem:[#allocation22_spill] sm:$0xff]  ;;  %v3269_v31 = vld [vmem:[#allocation24_spill] sm:$0xff] }
  0x82   :  { %1942 = vmatpush1.bf16.msra.mxu0 %v3256_v46  ;;  %v324_v50 = vadd.f32 %v323_v39, %v322_v23  ;;  %v446_v63 = vrot.slane %v2782_v45, 4  ;;  %v442_v30 = vrot.slane %v441_v14, 2  ;;  %v452_v28 = vrot.slane %v2788_v61, 4 }
  0x83   :  { %1944 = vmatprep.subr.bf16.mxu0 %v3258_v21  ;;  %v329_v51 = vrot.slane %v328_v3, 1  ;;  %v380_v22 = vcombine.low %v312_v59, %v318_v1  ;;  %v371_v34 = vcombine.low %v2786_v60, %v370_v62  ;;  %v458_v53 = vrot.slane %v2796_v7, 4  ;;  %v3268_v59 = vld [vmem:[#allocation25_spill] sm:$0xff] }
  0x84   :  { %v447_v2 = vmax.f32 %v2782_v45, %v446_v63  ;;  %v476_v35 = vrot.slane %v2798_v9, 4  ;;  %v3261_v38 = vpack.c.bf16 %v3259_v36, %v3260_v37  ;;  %v443_v48 = vmax.f32 %v441_v14, %v442_v30 }
  0x85   :  { %v330_v40 = vadd.f32 %v329_v51, %v328_v3  ;;  %v388_v41 = vrot.slane %v380_v22, %v2630_v10  ;;  %v453_v0 = vmax.f32 %v2788_v61, %v452_v28  ;;  %v3264_v6 = vpack.c.bf16 %v3262_v4, %v3263_v5  ;;  %v3271_v51 = vld [vmem:[#allocation27_spill] sm:$0xff]  ;;  %v3272_v22 = vld [vmem:[#allocation26_spill] sm:$0xff] }
  0x86   :  { %1946 = vmatpush1.bf16.msra.mxu0 %v3261_v38  ;;  %v448_v11 = vrot.slane %v447_v2, 2  ;;  %v459_v54 = vmax.f32 %v2796_v7, %v458_v53  ;;  %v477_v55 = vmax.f32 %v2798_v9, %v476_v35  ;;  %v482_v13 = vrot.slane %v2808_v27, 4 }
  0x87   :  { %1948 = vmatprep.subr.bf16.mxu0 %v3264_v6  ;;  %v381_v25 = vcombine.low %v324_v50, %v330_v40  ;;  %v444_v42 = vrot.slane %v443_v48, 1  ;;  %v454_v43 = vrot.slane %v453_v0, 2  ;;  %v488_v33 = vrot.slane %v2812_v52, 4  ;;  %v3274_v40 = vld [vmem:[#allocation29_spill] sm:$0xff] }
  0x88   :  { %v449_v56 = vmax.f32 %v447_v2, %v448_v11  ;;  %v460_v57 = vrot.slane %v459_v54, 2  ;;  %v478_v17 = vrot.slane %v477_v55, 2  ;;  %v483_v18 = vmax.f32 %v2808_v27, %v482_v13 }
  0x89   :  { %v3267_v19 = vpack.c.bf16 %v3265_v32, %v3266_v12  ;;  %v395_v20 = vrot.slane %v381_v25, %v2630_v10  ;;  %v445_v23 = vmax.f32 %v443_v48, %v444_v42  ;;  %v455_v24 = vmax.f32 %v453_v0, %v454_v43  ;;  %v3275_v48 = vld [vmem:[#allocation28_spill] sm:$0xff] }
  0x8a   :  { %v489_v58 = vmax.f32 %v2812_v52, %v488_v33  ;;  %v3270_v44 = vpack.c.bf16 %v3268_v59, %v3269_v31  ;;  %v450_v8 = vrot.slane %v449_v56, 1  ;;  %v461_v39 = vmax.f32 %v459_v54, %v460_v57 }
  0x8b   :  { %1950 = vmatpush1.bf16.msra.mxu0 %v3267_v19  ;;  %v479_v16 = vmax.f32 %v477_v55, %v478_v17  ;;  %v484_v60 = vrot.slane %v483_v18, 2  ;;  %v396_v46 = vcombine.low %v388_v41, %v395_v20  ;;  %v456_v1 = vrot.slane %v455_v24, 1  ;;  %v3277_v17 = vld [vmem:[#allocation31_spill] sm:$0xff] }
  0x8c   :  { %1952 = vmatprep.subr.bf16.mxu0 %v3270_v44  ;;  %v490_v3 = vrot.slane %v489_v58, 2  ;;  %v494_v14 = vrot.slane %v2837_v49, 4  ;;  %v451_v15 = vmax.f32 %v449_v56, %v450_v8  ;;  %v462_v21 = vrot.slane %v461_v39, 1 }
  0x8d   :  { %v480_v50 = vrot.slane %v479_v16, 1  ;;  %v485_v62 = vmax.f32 %v483_v18, %v484_v60  ;;  %v3273_v30 = vpack.c.bf16 %v3271_v51, %v3272_v22  ;;  %v407_v2 = vrot.slane %v396_v46, 7  ;;  %v3278_v18 = vld [vmem:[#allocation30_spill] sm:$0xff] }
  0x8e   :  { %v457_v36 = vmax.f32 %v455_v24, %v456_v1  ;;  %v491_v37 = vmax.f32 %v489_v58, %v490_v3  ;;  %v495_v38 = vmax.f32 %v2837_v49, %v494_v14  ;;  %v3276_v41 = vpack.c.bf16 %v3274_v40, %v3275_v48 }
  0x8f   :  { %1954 = vmatpush1.bf16.msra.mxu0 %v3273_v30  ;;  %v463_v0 = vmax.f32 %v461_v39, %v462_v21  ;;  %v481_v4 = vmax.f32 %v479_v16, %v480_v50  ;;  %v486_v5 = vrot.slane %v485_v62, 1  ;;  %v524_v6 = vcombine.low %v445_v23, %v451_v15 }
  0x90   :  { %1956 = vmatprep.subr.bf16.mxu0 %v3276_v41  ;;  %v408_v11 = vsel %vm247_vm0, %v407_v2, %v371_v34  ;;  %v492_v54 = vrot.slane %v491_v37, 1  ;;  %v496_v55 = vrot.slane %v495_v38, 2  ;;  %v598_v25 = vadd.f32 %v440_v29, %v2768_v26 }
  0x91   :  { %v409_v42 = vsel %vm249_vm1, %v407_v2, %v408_v11  ;;  %v487_v43 = vmax.f32 %v485_v62, %v486_v5  ;;  %v525_v56 = vcombine.low %v457_v36, %v463_v0  ;;  %v532_v57 = vrot.slane %v524_v6, %v2630_v10 }
  0x92   :  { %v3279_v32 = vpack.c.bf16 %v3277_v17, %v3278_v18  ;;  %v410_v12 = vsel %vm251_vm2, %v407_v2, %v409_v42  ;;  %v493_v19 = vmax.f32 %v491_v37, %v492_v54  ;;  %v497_v34 = vmax.f32 %v495_v38, %v496_v55  ;;  %v986_v55 = vld [vmem:[#allocation8 + $0x208] sm:$0xff] }
  0x93   :  { %v599_v20 = vrot.slane %v598_v25, 2  ;;  %v411_v23 = vsel %vm253_vm3, %v407_v2, %v410_v12  ;;  %v539_v24 = vrot.slane %v525_v56, %v2630_v10  ;;  %v549_v26 = vcombine.low %v481_v4, %v487_v43 }
  0x94   :  { %1958 = vmatpush1.bf16.msra.mxu0 %v3279_v32  ;;  %v604_v29 = vadd.f32 %v446_v63, %v2782_v45  ;;  %v498_v58 = vrot.slane %v497_v34, 1  ;;  %v610_v31 = vadd.f32 %v452_v28, %v2788_v61  ;;  %v616_v16 = vadd.f32 %v458_v53, %v2796_v7 }
  0x95   :  { %v600_v59 = vadd.f32 %v599_v20, %v598_v25  ;;  %v540_v44 = vcombine.low %v532_v57, %v539_v24  ;;  %v557_v8 = vrot.slane %v549_v26, %v2630_v10  ;;  %v634_v45 = vadd.f32 %v476_v35, %v2798_v9  ;;  %v988_v25 = vld [vmem:[#allocation8 + $0x218] sm:$0xff] }
  0x96   :  { %v605_v39 = vrot.slane %v604_v29, 2  ;;  %v499_v60 = vmax.f32 %v497_v34, %v498_v58  ;;  %v611_v1 = vrot.slane %v610_v31, 2  ;;  %v617_v3 = vrot.slane %v616_v16, 2 }
  0x97   :  { %v601_v46 = vrot.slane %v600_v59, 1  ;;  %v640_v61 = vadd.f32 %v482_v13, %v2808_v27  ;;  %v646_v28 = vadd.f32 %v488_v33, %v2812_v52  ;;  %v635_v53 = vrot.slane %v634_v45, 2 }
  0x98   :  { %v606_v63 = vadd.f32 %v605_v39, %v604_v29  ;;  %v550_v15 = vcombine.low %v493_v19, %v499_v60  ;;  %v612_v7 = vadd.f32 %v611_v1, %v610_v31  ;;  %v618_v62 = vadd.f32 %v617_v3, %v616_v16 }
  0x99   :  { %v602_v21 = vadd.f32 %v601_v46, %v600_v59  ;;  %v641_v51 = vrot.slane %v640_v61, 2  ;;  %v647_v22 = vrot.slane %v646_v28, 2  ;;  %v636_v30 = vadd.f32 %v635_v53, %v634_v45 }
  0x9a   :  { %v607_v50 = vrot.slane %v606_v63, 1  ;;  %v564_v9 = vrot.slane %v550_v15, %v2630_v10  ;;  %v613_v35 = vrot.slane %v612_v7, 1  ;;  %v652_v2 = vadd.f32 %v494_v14, %v2837_v49 }
  0x9b   :  { %v619_v27 = vrot.slane %v618_v62, 1  ;;  %v642_v13 = vadd.f32 %v641_v51, %v640_v61  ;;  %v648_v37 = vadd.f32 %v647_v22, %v646_v28  ;;  %v637_v33 = vrot.slane %v636_v30, 1  ;;  %v2917_v51 = vld [vmem:[#allocation8 + $0x200] sm:$0xff]  ;;  %v2919_v22 = vld [vmem:[#allocation8 + $0x210] sm:$0xff] }
  0x9c   :  { %v608_v36 = vadd.f32 %v607_v50, %v606_v63  ;;  %v565_v38 = vcombine.low %v557_v8, %v564_v9  ;;  %v614_v52 = vadd.f32 %v613_v35, %v612_v7  ;;  %v653_v40 = vrot.slane %v652_v2, 2 }
  0x9d   :  { %v620_v48 = vadd.f32 %v619_v27, %v618_v62  ;;  %v643_v41 = vrot.slane %v642_v13, 1  ;;  %v649_v0 = vrot.slane %v648_v37, 1  ;;  %v638_v5 = vadd.f32 %v637_v33, %v636_v30  ;;  %v2929_v27 = vld [vmem:[#allocation8 + $0x220] sm:$0xff] }
  0x9e   :  { %v576_v4 = vrot.slane %v565_v38, 7  ;;  %v654_v6 = vadd.f32 %v653_v40, %v652_v2  ;;  %v681_v54 = vcombine.low %v602_v21, %v608_v36  ;;  %v758_v17 = vmul.f32 0.125, %v411_v23  ;;  %v2925_v2 = vld [vmem:[#allocation8 + $0x228] sm:$0xff]  ;;  %v2927_v36 = vld [vmem:[#allocation8 + $0x238] sm:$0xff]  ;;  %v2939_v40 = vld [vmem:[#allocation8 + $0x240] sm:$0xff] }
  0x9f   :  { %v644_v11 = vadd.f32 %v643_v41, %v642_v13  ;;  %v650_v14 = vadd.f32 %v649_v0, %v648_v37  ;;  %v682_v43 = vcombine.low %v614_v52, %v620_v48  ;;  %v1959_v12 = vpack.c.bf16 %v988_v25, %v986_v55  ;;  %v2931_v13 = vld [vmem:[#allocation8 + $0x230] sm:$0xff]  ;;  %v2933_v37 = vld [vmem:[#allocation8 + $0x248] sm:$0xff]  ;;  %v2935_v38 = vld [vmem:[#allocation8 + $0x258] sm:$0xff] }
  0xa0   :  { %v577_v49 = vsel %vm247_vm0, %v576_v4, %v540_v44  ;;  %v655_v42 = vrot.slane %v654_v6, 1  ;;  %v689_v34 = vrot.slane %v681_v54, %v2630_v10  ;;  %v801_v29 = vcombine.low %v758_v17, %v758_v17  ;;  %v2941_v48 = vld [vmem:[#allocation8 + $0x250] sm:$0xff]  ;;  %v2943_v41 = vld [vmem:[#allocation8 + $0x268] sm:$0xff]  ;;  %v2945_v0 = vld [vmem:[#allocation8 + $0x278] sm:$0xff] }
  0xa1   :  { %v578_v56 = vsel %vm249_vm1, %v576_v4, %v577_v49  ;;  %v706_v57 = vcombine.low %v638_v5, %v644_v11  ;;  %v696_v20 = vrot.slane %v682_v43, %v2630_v10  ;;  %1960 = vmatprep.subr.bf16.mxu0 %v1959_v12  ;;  %v775_v23 = vrot.slane %v2794_v47, %v2630_v10  ;;  %v2949_v5 = vld [vmem:[#allocation8 + $0x270] sm:$0xff]  ;;  %v2955_v54 = vld [vmem:[#allocation8 + $0x288] sm:$0xff]  ;;  %v2957_v55 = vld [vmem:[#allocation8 + $0x298] sm:$0xff] }
  0xa2   :  { %v579_v18 = vsel %vm251_vm2, %v576_v4, %v578_v56  ;;  %v656_v32 = vadd.f32 %v655_v42, %v654_v6  ;;  %v808_v44 = vrot.slane %v801_v29, %v2630_v10  ;;  %v768_v16 = vcombine.high %v2794_v47, %v2794_v47  ;;  %v2959_v25 = vld [vmem:[#allocation8 + $0x280] sm:$0xff]  ;;  %v2961_v49 = vld [vmem:[#allocation8 + $0x290] sm:$0xff]  ;;  %v2965_v42 = vld [vmem:[#allocation8 + $0x2b8] sm:$0xff] }
  0xa3   :  { %v580_v19 = vsel %vm253_vm3, %v576_v4, %v579_v18  ;;  %v714_v26 = vrot.slane %v706_v57, %v2630_v10  ;;  %v697_v59 = vcombine.low %v689_v34, %v696_v20  ;;  %v783_v46 = vcombine.high %v775_v23, %v775_v23  ;;  %v2947_v4 = vld [vmem:[#allocation8 + $0x260] sm:$0xff]  ;;  %v2969_v56 = vld [vmem:[#allocation8 + $0x2b0] sm:$0xff]  ;;  %v2974_v18 = vld [vmem:[#allocation8 + $0x2c8] sm:$0xff] }
  0xa4   :  { %v707_v24 = vcombine.low %v650_v14, %v656_v32  ;;  %v816_v1 = vcombine.high %v808_v44, %v808_v44  ;;  %v835_v63 = vcombine.high %v580_v19, %v580_v19  ;;  %v842_v61 = vrot.slane %v580_v19, %v2630_v10  ;;  %v2963_v14 = vld [vmem:[#allocation8 + $0x2a8] sm:$0xff]  ;;  %v2967_v43 = vld [vmem:[#allocation8 + $0x2a0] sm:$0xff]  ;;  %v2976_v32 = vld [vmem:[#allocation8 + $0x2d8] sm:$0xff] }
  0xa5   :  { %v782_v28 = vrot.slane %v768_v16, %v2630_v10  ;;  %v815_v15 = vrot.slane %v758_v17, %v2630_v10  ;;  %v901_v30 = vsel %vm900_vm4, %v775_v23, %v808_v44  ;;  %v2978_v12 = vld [vmem:[#allocation8 + $0x2c0] sm:$0xff]  ;;  %v2980_v19 = vld [vmem:[#allocation8 + $0x2d0] sm:$0xff]  ;;  %v2987_v29 = vld [vmem:[#allocation8 + $0x2f8] sm:$0xff]  ;;  %v1967_v23 = vpack.c.bf16 %v2935_v38, %v2933_v37 }
  0xa6   :  { %v721_v58 = vrot.slane %v707_v24, %v2630_v10  ;;  %v902_v21 = vsel %vm900_vm4, %v783_v46, %v816_v1  ;;  %v2915_v50 = vrot.slane %v835_v63, %v2630_v10  ;;  %v850_v62 = vcombine.low %v842_v61, %v842_v61  ;;  %v2997_v44 = vld [vmem:[#allocation8 + $0x2f0] sm:$0xff]  ;;  %v98_v16 = vld [vmem:[#allocation3 + $0x20] sm:$0xff]  ;;  %v3010_v63 = vld [vmem:[#allocation8 + $0x318] sm:$0xff] }
  0xa7   :  { %v784_v7 = vcombine.high %v782_v28, %v782_v28  ;;  %v817_v53 = vcombine.high %v815_v15, %v815_v15  ;;  %v2922_v9 = vsel %vm900_vm4, %v782_v28, %v815_v15  ;;  %v909_v33 = vsel %vm907_vm5, %v902_v21, %v842_v61  ;;  %v104_v61 = vld [vmem:[#allocation3 + $0x50] sm:$0xff] }
  0xa8   :  { %v722_v31 = vcombine.low %v714_v26, %v721_v58  ;;  %v908_v17 = vsel %vm907_vm5, %v901_v30, %v850_v62  ;;  %v1961_v24 = vpack.c.bf16 %v2919_v22, %v2917_v51  ;;  %v2985_v26 = vld [vmem:[#allocation8 + $0x2e8] sm:$0xff]  ;;  %v2989_v58 = vld [vmem:[#allocation8 + $0x2e0] sm:$0xff]  ;;  %v1969_v46 = vpack.c.bf16 %v2941_v48, %v2939_v40 }
  0xa9   :  { %v904_v52 = vsel %vm900_vm4, %v784_v7, %v817_v53  ;;  %v1971_v1 = vpack.c.bf16 %v2945_v0, %v2943_v41  ;;  %v1975_v28 = vpack.c.bf16 %v2957_v55, %v2955_v54  ;;  %v1977_v15 = vpack.c.bf16 %v2961_v49, %v2959_v25  ;;  %v105_v7 = vld [vmem:[#allocation3 + $0x58] sm:$0xff]  ;;  %v3020_v53 = vld [vmem:[#allocation6 + $0x20] sm:$0xff]  ;;  %v430_v62 = vld [vmem:[#allocation6 + $0x28] sm:$0xff] }
  0xaa   :  { %v733_v8 = vrot.slane %v722_v31, 7  ;;  %v911_v57 = vsel %vm907_vm5, %v904_v52, %v2915_v50  ;;  %v1965_v31 = vpack.c.bf16 %v2931_v13, %v2929_v27  ;;  %v1979_v21 = vpack.c.bf16 %v2965_v42, %v2963_v14 }
  0xab   :  { %v168_v27 = vrot.slane %v104_v61, 4  ;;  %v174_v37 = vrot.slane %v105_v7, 4  ;;  %v464_v52 = vrot.slane %v3020_v53, 4 }
  0xac   :  { %v734_v39 = vsel %vm247_vm0, %v733_v8, %v697_v59  ;;  %v1963_v59 = vpack.c.bf16 %v2927_v36, %v2925_v2 }
  0xad   :  { %v735_v60 = vsel %vm249_vm1, %v733_v8, %v734_v39  ;;  %v169_v40 = vmax.f32 %v104_v61, %v168_v27  ;;  %v332_v41 = vadd.f32 %v168_v27, %v104_v61 }
  0xae   :  { %v736_v45 = vsel %vm251_vm2, %v733_v8, %v735_v60 }
  0xaf   :  { %v737_v3 = vsel %vm253_vm3, %v733_v8, %v736_v45  ;;  %v2999_v8 = vld [vmem:[#allocation8 + $0x308] sm:$0xff]  ;;  %v1973_v45 = vpack.c.bf16 %v2949_v5, %v2947_v4 }
  0xb0   :  { %v764_v47 = vmul.f32 0.125, %v737_v3  ;;  %v99_v3 = vld [vmem:[#allocation3 + $0x28] sm:$0xff] }
  0xb1   :  { %v138_v36 = vrot.slane %v99_v3, 4 }
  0xb2   :  { %v868_v35 = vcombine.low %v764_v47, %v764_v47  ;;  %v2952_v6 = vrot.slane %v764_v47, %v2630_v10 }
  0xb3   :  { %v302_v48 = vadd.f32 %v138_v36, %v99_v3 }
  0xb4   :  { %v875_v11 = vrot.slane %v868_v35, %v2630_v10  ;;  %v918_v39 = vsel %vm914_vm6, %v911_v57, %v2952_v6  ;;  %v132_v35 = vrot.slane %v98_v16, 4 }
  0xb6   :  { %v916_v34 = vsel %vm914_vm6, %v909_v33, %v875_v11  ;;  %v883_v20 = vcombine.low %v875_v11, %v875_v11  ;;  %v133_v13 = vmax.f32 %v98_v16, %v132_v35  ;;  %v296_v38 = vadd.f32 %v132_v35, %v98_v16 }
  0xb7   :  { %1382 = vmatprep.mubr.f32.mxu0 %v916_v34  ;;  %v139_v33 = vmax.f32 %v99_v3, %v138_v36  ;;  %v175_v11 = vmax.f32 %v105_v7, %v174_v37 }
  0xb8   :  { %v915_v60 = vsel %vm914_vm6, %v908_v17, %v883_v20  ;;  %v134_v0 = vrot.slane %v133_v13, 2  ;;  %v297_v57 = vrot.slane %v296_v38, 2  ;;  %v338_v17 = vadd.f32 %v174_v37, %v105_v7 }
  0xb9   :  { %1383 = vmatmul.mubr.f32.vlgmr.msra.gmra.mrb[0].mxu0 %v915_v60  ;;  %v140_v34 = vrot.slane %v139_v33, 2  ;;  %v170_v20 = vrot.slane %v169_v40, 2  ;;  %v176_v60 = vrot.slane %v175_v11, 2 }
  0xba   :  { %1962 = vmatpush1.bf16.msra.mxu0 %v1961_v24  ;;  %1453 = vmatprep.mubr.f32.mxu0 %v918_v39  ;;  %v303_v24 = vrot.slane %v302_v48, 2  ;;  %v135_v39 = vmax.f32 %v133_v13, %v134_v0  ;;  %v298_v2 = vadd.f32 %v297_v57, %v296_v38  ;;  %v339_v16 = vrot.slane %v338_v17, 2  ;;  %v3033_v57 = vld [vmem:[#allocation6 + $0x50] sm:$0xff] }
  0xbb   :  { %1964 = vmatprep.subr.bf16.mxu0 %v1963_v59  ;;  %v333_v59 = vrot.slane %v332_v41, 2  ;;  %v141_v35 = vmax.f32 %v139_v33, %v140_v34  ;;  %v171_v30 = vmax.f32 %v169_v40, %v170_v20  ;;  %v3035_v33 = vld [vmem:[#allocation6 + $0x58] sm:$0xff] }
  0xbc   :  { %v304_v22 = vadd.f32 %v303_v24, %v302_v48  ;;  %v136_v3 = vrot.slane %v135_v39, 1  ;;  %v299_v61 = vrot.slane %v298_v2, 1  ;;  %v340_v36 = vadd.f32 %v339_v16, %v338_v17 }
  0xbd   :  { %v334_v51 = vadd.f32 %v333_v59, %v332_v41  ;;  %v142_v7 = vrot.slane %v141_v35, 1  ;;  %v465_v17 = vmax.f32 %v3020_v53, %v464_v52 }
  0xbe   :  { %1966 = vmatpush1.bf16.msra.mxu0 %v1965_v31  ;;  %v177_v31 = vmax.f32 %v175_v11, %v176_v60  ;;  %v305_v27 = vrot.slane %v304_v22, 1  ;;  %v137_v47 = vmax.f32 %v135_v39, %v136_v3  ;;  %v300_v0 = vadd.f32 %v299_v61, %v298_v2 }
  0xbf   :  { %1968 = vmatprep.subr.bf16.mxu0 %v1967_v23  ;;  %v172_v23 = vrot.slane %v171_v30, 1  ;;  %v335_v37 = vrot.slane %v334_v51, 1  ;;  %v341_v38 = vrot.slane %v340_v36, 1  ;;  %v143_v40 = vmax.f32 %v141_v35, %v142_v7 }
  0xc0   :  { %v178_v13 = vrot.slane %v177_v31, 1  ;;  %v306_v48 = vadd.f32 %v305_v27, %v304_v22  ;;  %v470_v2 = vrot.slane %v430_v62, 4  ;;  %v500_v22 = vrot.slane %v3033_v57, 4 }
  0xc1   :  { %v336_v41 = vadd.f32 %v335_v37, %v334_v51  ;;  %v342_v11 = vadd.f32 %v341_v38, %v340_v36  ;;  %v209_v34 = vcombine.low %v137_v47, %v143_v40  ;;  %v506_v51 = vrot.slane %v3035_v33, 4 }
  0xc2   :  { %1970 = vmatpush1.bf16.msra.mxu0 %v1969_v46  ;;  %v173_v46 = vmax.f32 %v171_v30, %v172_v23  ;;  %v372_v20 = vcombine.low %v300_v0, %v306_v48  ;;  %v466_v5 = vrot.slane %v465_v17, 2  ;;  %v501_v39 = vmax.f32 %v3033_v57, %v500_v22  ;;  %v270_v0 = vld [vmem:[#allocation2 + $0x14] sm:$0xf] }
  0xc3   :  { %1972 = vmatprep.subr.bf16.mxu0 %v1971_v1  ;;  %v179_v1 = vmax.f32 %v177_v31, %v178_v13  ;;  %v397_v4 = vcombine.low %v336_v41, %v342_v11  ;;  %v216_v24 = vrot.slane %v209_v34, %v2630_v10  ;;  %v507_v54 = vmax.f32 %v3035_v33, %v506_v51 }
  0xc4   :  { %v379_v59 = vrot.slane %v372_v20, %v2630_v10  ;;  %v467_v47 = vmax.f32 %v465_v17, %v466_v5  ;;  %v502_v16 = vrot.slane %v501_v39, 2  ;;  %v622_v3 = vadd.f32 %v464_v52, %v3020_v53  ;;  %v1121_v20 = vld [vmem:[#allocation9 + $0x38] sm:$0xff] }
  0xc5   :  { %v234_v30 = vcombine.low %v173_v46, %v179_v1  ;;  %v508_v35 = vrot.slane %v507_v54, 2  ;;  %v628_v31 = vadd.f32 %v470_v2, %v430_v62  ;;  %v3280_v37 = vpack.c.bf16 %v2969_v56, %v2967_v43  ;;  %v3077_v43 = vld [vmem:[#allocation8 + $0x300] sm:$0xff]  ;;  %v3079_v56 = vld [vmem:[#allocation8 + $0x310] sm:$0xff] }
  0xc6   :  { %1974 = vmatpush1.bf16.msra.mxu0 %v1973_v45  ;;  %v471_v45 = vmax.f32 %v430_v62, %v470_v2  ;;  %v468_v49 = vrot.slane %v467_v47, 1  ;;  %v503_v36 = vmax.f32 %v501_v39, %v502_v16  ;;  %v623_v23 = vrot.slane %v622_v3, 2  ;;  %v107_v62 = vld [vmem:[#allocation2 + $0x8] sm:$0xf] }
  0xc7   :  { %1976 = vmatprep.subr.bf16.mxu0 %v1975_v28  ;;  %v241_v55 = vrot.slane %v234_v30, %v2630_v10  ;;  %v404_v28 = vrot.slane %v397_v4, %v2630_v10  ;;  %v509_v7 = vmax.f32 %v507_v54, %v508_v35  ;;  %v629_v27 = vrot.slane %v628_v31, 2  ;;  %v1114_v30 = vld [vmem:[#allocation9] sm:$0xff]  ;;  %v1120_v4 = vld [vmem:[#allocation9 + $0x30] sm:$0xff]  ;;  %v1133_v35 = vld [vmem:[#allocation9 + $0x98] sm:$0xff] }
  0xc8   :  { %v472_v60 = vrot.slane %v471_v45, 2  ;;  %v3281_v53 = vpack.c.bf16 %v2976_v32, %v2974_v18  ;;  %v504_v40 = vrot.slane %v503_v36, 1  ;;  %v624_v11 = vadd.f32 %v623_v23, %v622_v3  ;;  %v1115_v18 = vld [vmem:[#allocation9 + $0x8] sm:$0xff] }
  0xc9   :  { %v257_v61 = vrot.slane %v241_v55, 7  ;;  %v414_v25 = vrot.slane %v404_v28, 7  ;;  %v510_v46 = vrot.slane %v509_v7, 1  ;;  %v3282_v5 = vpack.c.bf16 %v2980_v19, %v2978_v12  ;;  %v1024_v28 = vld [vmem:[#allocation8 + $0x338] sm:$0xff]  ;;  %v1127_v19 = vld [vmem:[#allocation9 + $0x68] sm:$0xff] }
  0xca   :  { %1978 = vmatpush1.bf16.msra.mxu0 %v1977_v15  ;;  %v473_v15 = vmax.f32 %v471_v45, %v472_v60  ;;  %v505_v2 = vmax.f32 %v503_v36, %v504_v40  ;;  %v1022_v45 = vld [vmem:[#allocation8 + $0x328] sm:$0xff]  ;;  %v625_v54 = vrot.slane %v624_v11, 1  ;;  %v3283_v55 = vpack.c.bf16 %v2987_v29, %v2985_v26  ;;  %v1021_v36 = vld [vmem:[#allocation8 + $0x320] sm:$0xff] }
  0xcb   :  { %1980 = vmatprep.subr.bf16.mxu0 %v1979_v21  ;;  %v258_v14 = vsel %vm247_vm0, %v257_v61, %v216_v24  ;;  %v415_v42 = vsel %vm247_vm0, %v414_v25, %v379_v59  ;;  %v469_v21 = vmax.f32 %v467_v47, %v468_v49  ;;  %v511_v34 = vmax.f32 %v509_v7, %v510_v46 }
  0xcc   :  { %v474_v13 = vrot.slane %v473_v15, 1  ;;  %v259_v52 = vsel %vm249_vm1, %v257_v61, %v258_v14  ;;  %v416_v38 = vsel %vm249_vm1, %v414_v25, %v415_v42  ;;  %v630_v60 = vadd.f32 %v629_v27, %v628_v31  ;;  %v1139_v27 = vld [vmem:[#allocation9 + $0xc8] sm:$0xff]  ;;  %v1023_v42 = vld [vmem:[#allocation8 + $0x330] sm:$0xff] }
  0xcd   :  { %v260_v48 = vsel %vm251_vm2, %v257_v61, %v259_v52  ;;  %v417_v41 = vsel %vm251_vm2, %v414_v25, %v416_v38  ;;  %v566_v47 = vcombine.low %v505_v2, %v511_v34  ;;  %v658_v16 = vadd.f32 %v500_v22, %v3033_v57  ;;  %v1126_v22 = vld [vmem:[#allocation9 + $0x60] sm:$0xff] }
  0xce   :  { %1982 = vmatpush1.bf16.msra.mxu0 %v3280_v37  ;;  %v475_v1 = vmax.f32 %v473_v15, %v474_v13  ;;  %v261_v32 = vsel %vm253_vm3, %v257_v61, %v260_v48  ;;  %v418_v17 = vsel %vm253_vm3, %v414_v25, %v417_v41  ;;  %v664_v12 = vadd.f32 %v506_v51, %v3035_v33  ;;  %v1132_v15 = vld [vmem:[#allocation9 + $0x90] sm:$0xff]  ;;  %v1145_v37 = vld [vmem:[#allocation9 + $0xf8] sm:$0xff] }
  0xcf   :  { %1984 = vmatprep.subr.bf16.mxu0 %v3281_v53  ;;  %v265_v24 = vmax.f32 %v107_v62, %v261_v32  ;;  %v422_v59 = vadd.f32 %v418_v17, %v270_v0  ;;  %v1993_v3 = vpack.c.bf16 %v3079_v56, %v3077_v43  ;;  %v2087_v29 = vpack.c.bf16 %v1121_v20, %v1115_v18  ;;  %v1028_v13 = vld [vmem:[#allocation8 + $0x358] sm:$0xff]  ;;  %v1138_v43 = vld [vmem:[#allocation9 + $0xc0] sm:$0xff]  ;;  %v1144_v56 = vld [vmem:[#allocation9 + $0xf0] sm:$0xff] }
  0xd0   :  { %v541_v39 = vcombine.low %v469_v21, %v475_v1  ;;  %v2089_v61 = vpack.c.bf16 %v1120_v4, %v1114_v30  ;;  %v573_v31 = vrot.slane %v566_v47, %v2630_v10  ;;  %v631_v25 = vrot.slane %v630_v60, 1  ;;  %v1026_v21 = vld [vmem:[#allocation8 + $0x348] sm:$0xff]  ;;  %v439_v48 = vld [vmem:[#allocation2 + $0x20] sm:$0xf]  ;;  %v1025_v18 = vld [vmem:[#allocation8 + $0x340] sm:$0xff] }
  0xd1   :  { %267 = vst [vmem:[#allocation2 + $0x8] sm:$0xf] %v265_v24  ;;  %424 = vst [vmem:[#allocation2 + $0x14] sm:$0xf] %v422_v59  ;;  %v659_v49 = vrot.slane %v658_v16, 2  ;;  %v665_v57 = vrot.slane %v664_v12, 2  ;;  %v3284_v33 = vpack.c.bf16 %v2997_v44, %v2989_v58  ;;  %v1995_v51 = vpack.c.bf16 %v1024_v28, %v1022_v45  ;;  %2088 = vmatprep.subr.bf16.mxu1 %v2087_v29 }
  0xd2   :  { %1986 = vmatpush1.bf16.msra.mxu0 %v3282_v5  ;;  %v548_v26 = vrot.slane %v541_v39, %v2630_v10  ;;  %v626_v7 = vadd.f32 %v625_v54, %v624_v11  ;;  %v2091_v23 = vpack.c.bf16 %v1133_v35, %v1127_v19  ;;  %v3285_v14 = vpack.c.bf16 %v3010_v63, %v2999_v8  ;;  %v1151_v1 = vld [vmem:[#allocation9 + $0x128] sm:$0xff]  ;;  %v1157_v11 = vld [vmem:[#allocation9 + $0x158] sm:$0xff]  ;;  %v1027_v32 = vld [vmem:[#allocation8 + $0x350] sm:$0xff] }
  0xd3   :  { %1988 = vmatprep.subr.bf16.mxu0 %v3283_v55  ;;  %v583_v53 = vrot.slane %v573_v31, 7  ;;  %v632_v62 = vadd.f32 %v631_v25, %v630_v60  ;;  %v660_v52 = vadd.f32 %v659_v49, %v658_v16  ;;  %v666_v0 = vadd.f32 %v665_v57, %v664_v12  ;;  %2090 = vmatpush1.bf16.msra.mxu1 %v2089_v61  ;;  %v1030_v4 = vld [vmem:[#allocation8 + $0x368] sm:$0xff]  ;;  %v1032_v5 = vld [vmem:[#allocation8 + $0x378] sm:$0xff]  ;;  %v1150_v28 = vld [vmem:[#allocation9 + $0x120] sm:$0xff] }
  0xd4   :  { %2092 = vmatprep.subr.bf16.mxu1 %v2091_v23  ;;  %v2093_v58 = vpack.c.bf16 %v1132_v15, %v1126_v22  ;;  %v2095_v46 = vpack.c.bf16 %v1145_v37, %v1139_v27  ;;  %v1997_v8 = vpack.c.bf16 %v1023_v42, %v1021_v36  ;;  %v1999_v63 = vpack.c.bf16 %v1028_v13, %v1026_v21  ;;  %v1156_v47 = vld [vmem:[#allocation9 + $0x150] sm:$0xff]  ;;  %v1163_v12 = vld [vmem:[#allocation9 + $0x188] sm:$0xff]  ;;  %v1169_v19 = vld [vmem:[#allocation9 + $0x1b8] sm:$0xff] }
  0xd5   :  { %v584_v44 = vsel %vm247_vm0, %v583_v53, %v548_v26  ;;  %v661_v38 = vrot.slane %v660_v52, 1  ;;  %v667_v40 = vrot.slane %v666_v0, 1  ;;  %v698_v20 = vcombine.low %v626_v7, %v632_v62  ;;  %v1031_v26 = vld [vmem:[#allocation8 + $0x370] sm:$0xff]  ;;  %v1034_v31 = vld [vmem:[#allocation8 + $0x388] sm:$0xff]  ;;  %v1036_v25 = vld [vmem:[#allocation8 + $0x398] sm:$0xff] }
  0xd6   :  { %1990 = vmatpush1.bf16.msra.mxu0 %v3284_v33  ;;  %v585_v41 = vsel %vm249_vm1, %v583_v53, %v584_v44  ;;  %v2097_v59 = vpack.c.bf16 %v1144_v56, %v1138_v43  ;;  %v2099_v55 = vpack.c.bf16 %v1157_v11, %v1151_v1  ;;  %v2001_v60 = vpack.c.bf16 %v1027_v32, %v1025_v18  ;;  %v1162_v22 = vld [vmem:[#allocation9 + $0x180] sm:$0xff]  ;;  %v1168_v36 = vld [vmem:[#allocation9 + $0x1b0] sm:$0xff]  ;;  %v1175_v27 = vld [vmem:[#allocation9 + $0x1e8] sm:$0xff] }
  0xd7   :  { %1992 = vmatprep.subr.bf16.mxu0 %v3285_v14  ;;  %v586_v17 = vsel %vm251_vm2, %v583_v53, %v585_v41  ;;  %v662_v2 = vadd.f32 %v661_v38, %v660_v52  ;;  %v668_v34 = vadd.f32 %v667_v40, %v666_v0  ;;  %2094 = vmatpush1.bf16.msra.mxu1 %v2093_v58  ;;  %v1181_v37 = vld [vmem:[#allocation9 + $0x218] sm:$0xff]  ;;  %v1033_v42 = vld [vmem:[#allocation8 + $0x380] sm:$0xff]  ;;  %v1035_v21 = vld [vmem:[#allocation8 + $0x390] sm:$0xff] }
  0xd8   :  { %v757_v30 = vld [vmem:[#allocation2 + $0x14] sm:$0xf]  ;;  %v587_v45 = vsel %vm253_vm3, %v583_v53, %v586_v17  ;;  %2096 = vmatprep.subr.bf16.mxu1 %v2095_v46  ;;  %v2003_v35 = vpack.c.bf16 %v1032_v5, %v1030_v4  ;;  %v705_v29 = vrot.slane %v698_v20, %v2630_v10  ;;  %v2101_v57 = vpack.c.bf16 %v1156_v47, %v1150_v28  ;;  %v3116_v33 = vld.sshfl [vmem:[#allocation2 + $0x8] sm:$0x33 pattern:$0x76325410] }
  0xd9   :  { %v759_v24 = vmul.f32 0.125, %v757_v30  ;;  %v591_v39 = vmax.f32 %v439_v48, %v587_v45  ;;  %v723_v54 = vcombine.low %v662_v2, %v668_v34  ;;  %v2007_v14 = vpack.c.bf16 %v1036_v25, %v1034_v31  ;;  %v1038_v53 = vld [vmem:[#allocation8 + $0x3a8] sm:$0xff]  ;;  %v1040_v62 = vld [vmem:[#allocation8 + $0x3b8] sm:$0xff]  ;;  %v1174_v40 = vld [vmem:[#allocation9 + $0x1e0] sm:$0xff] }
  0xda   :  { %1994 = vmatpush1.bf16.msra.mxu0 %v1993_v3  ;;  %v1029_v3 = vld [vmem:[#allocation8 + $0x360] sm:$0xff]  ;;  %v596_v52 = vld [vmem:[#allocation2 + $0x2c] sm:$0xf]  ;;  %v2105_v58 = vpack.c.bf16 %v1168_v36, %v1162_v22  ;;  %v2107_v38 = vpack.c.bf16 %v1181_v37, %v1175_v27  ;;  %v1180_v46 = vld [vmem:[#allocation9 + $0x210] sm:$0xff]  ;;  %v2009_v43 = vpack.c.bf16 %v1035_v21, %v1033_v42  ;;  %v2011_v48 = vpack.c.bf16 %v1040_v62, %v1038_v53 }
  0xdb   :  { %1996 = vmatprep.subr.bf16.mxu0 %v1995_v51  ;;  %v818_v16 = vcombine.low %v759_v24, %v759_v24  ;;  %593 = vst [vmem:[#allocation2 + $0x20] sm:$0xf] %v591_v39  ;;  %v730_v61 = vrot.slane %v723_v54, %v2630_v10  ;;  %2098 = vmatpush1.bf16.msra.mxu1 %v2097_v59  ;;  %v1037_v41 = vld [vmem:[#allocation8 + $0x3a0] sm:$0xff]  ;;  %v1039_v1 = vld [vmem:[#allocation8 + $0x3b0] sm:$0xff]  ;;  %v1042_v18 = vld [vmem:[#allocation8 + $0x3c8] sm:$0xff] }
  0xdc   :  { %2100 = vmatprep.subr.bf16.mxu1 %v2099_v55  ;;  %v2103_v51 = vpack.c.bf16 %v1169_v19, %v1163_v12  ;;  %v2005_v7 = vpack.c.bf16 %v1031_v26, %v1029_v3  ;;  %v1044_v32 = vld [vmem:[#allocation8 + $0x3d8] sm:$0xff]  ;;  %v2109_v17 = vpack.c.bf16 %v1180_v46, %v1174_v40  ;;  %v1186_v34 = vld [vmem:[#allocation9 + $0x240] sm:$0xff]  ;;  %v1192_v20 = vld [vmem:[#allocation9 + $0x270] sm:$0xff]  ;;  %v2013_v30 = vpack.c.bf16 %v1039_v1, %v1037_v41 }
  0xdd   :  { %v3114_v49 = vrot.slane %v818_v16, %v2630_v10  ;;  %v740_v15 = vrot.slane %v730_v61, 7  ;;  %v1199_v4 = vld [vmem:[#allocation9 + $0x2a8] sm:$0xff]  ;;  %v1205_v5 = vld [vmem:[#allocation9 + $0x2d8] sm:$0xff]  ;;  %v2015_v45 = vpack.c.bf16 %v1044_v32, %v1042_v18  ;;  %v1041_v24 = vld [vmem:[#allocation8 + $0x3c0] sm:$0xff]  ;;  %v2113_v55 = vpack.c.bf16 %v1192_v20, %v1186_v34 }
  0xde   :  { %1998 = vmatpush1.bf16.msra.mxu0 %v1997_v8  ;;  %v1187_v8 = vld [vmem:[#allocation9 + $0x248] sm:$0xff]  ;;  %v1043_v59 = vld [vmem:[#allocation8 + $0x3d0] sm:$0xff]  ;;  %v1048_v54 = vld [vmem:[#allocation8 + $0x3f8] sm:$0xff]  ;;  %v792_v28 = vcombine.high %v3116_v33, %v3116_v33  ;;  %v851_v25 = vcombine.low %v2915_v50, %v2915_v50 }
  0xdf   :  { %2000 = vmatprep.subr.bf16.mxu0 %v1999_v63  ;;  %v3121_v23 = vsel %vm900_vm4, %v3116_v33, %v3114_v49  ;;  %v741_v13 = vsel %vm247_vm0, %v740_v15, %v705_v29  ;;  %2102 = vmatpush1.bf16.msra.mxu1 %v2101_v57  ;;  %v1193_v63 = vld [vmem:[#allocation9 + $0x278] sm:$0xff]  ;;  %v1046_v39 = vld [vmem:[#allocation8 + $0x3e8] sm:$0xff]  ;;  %v826_v47 = vcombine.high %v3114_v49, %v3114_v49  ;;  %v1198_v16 = vld [vmem:[#allocation9 + $0x2a0] sm:$0xff] }
  0xe0   :  { %v742_v0 = vsel %vm249_vm1, %v740_v15, %v741_v13  ;;  %2104 = vmatprep.subr.bf16.mxu1 %v2103_v51  ;;  %v2111_v2 = vpack.c.bf16 %v1193_v63, %v1187_v8  ;;  %v1204_v12 = vld [vmem:[#allocation9 + $0x2d0] sm:$0xff]  ;;  %v2017_v19 = vpack.c.bf16 %v1043_v59, %v1041_v24  ;;  %v1217_v3 = vld [vmem:[#allocation9 + $0x338] sm:$0xff]  ;;  %v2019_v26 = vpack.c.bf16 %v1048_v54, %v1046_v39  ;;  %v1045_v29 = vld [vmem:[#allocation8 + $0x3e0] sm:$0xff] }
  0xe1   :  { %v743_v44 = vsel %vm251_vm2, %v740_v15, %v742_v0  ;;  %v1047_v61 = vld [vmem:[#allocation8 + $0x3f0] sm:$0xff]  ;;  %v1050_v31 = vld [vmem:[#allocation8 + $0x408] sm:$0xff]  ;;  %v1052_v57 = vld [vmem:[#allocation8 + $0x418] sm:$0xff]  ;;  %v2117_v49 = vpack.c.bf16 %v1204_v12, %v1198_v16  ;;  %v906_v36 = vsel %vm900_vm4, %v792_v28, %v826_v47  ;;  %v910_v13 = vsel %vm907_vm5, %v2922_v9, %v851_v25 }
  0xe2   :  { %2002 = vmatpush1.bf16.msra.mxu0 %v2001_v60  ;;  %v744_v56 = vsel %vm253_vm3, %v740_v15, %v743_v44  ;;  %v2115_v60 = vpack.c.bf16 %v1205_v5, %v1199_v4  ;;  %v1210_v15 = vld [vmem:[#allocation9 + $0x300] sm:$0xff]  ;;  %v3133_v33 = vld.sshfl [vmem:[#allocation2 + $0x20] sm:$0x33 pattern:$0x76325410]  ;;  %v2021_v37 = vpack.c.bf16 %v1047_v61, %v1045_v29  ;;  %v1223_v42 = vld [vmem:[#allocation9 + $0x368] sm:$0xff]  ;;  %v2023_v21 = vpack.c.bf16 %v1052_v57, %v1050_v31 }
  0xe3   :  { %2004 = vmatprep.subr.bf16.mxu0 %v2003_v35  ;;  %v748_v11 = vadd.f32 %v744_v56, %v596_v52  ;;  %2106 = vmatpush1.bf16.msra.mxu1 %v2105_v58  ;;  %v1211_v35 = vld [vmem:[#allocation9 + $0x308] sm:$0xff]  ;;  %v1216_v27 = vld [vmem:[#allocation9 + $0x330] sm:$0xff]  ;;  %v1229_v50 = vld [vmem:[#allocation9 + $0x398] sm:$0xff]  ;;  %v913_v44 = vsel %vm907_vm5, %v906_v36, %v3133_v33 }
  0xe4   :  { %2108 = vmatprep.subr.bf16.mxu1 %v2107_v38  ;;  %v1049_v53 = vld [vmem:[#allocation8 + $0x400] sm:$0xff]  ;;  %v1051_v62 = vld [vmem:[#allocation8 + $0x410] sm:$0xff]  ;;  %v1054_v0 = vld [vmem:[#allocation8 + $0x428] sm:$0xff]  ;;  %v2121_v38 = vpack.c.bf16 %v1216_v27, %v1210_v15 }
  0xe5   :  { %750 = vst [vmem:[#allocation2 + $0x2c] sm:$0xf] %v748_v11  ;;  %v1056_v58 = vld [vmem:[#allocation8 + $0x438] sm:$0xff]  ;;  %v1222_v46 = vld [vmem:[#allocation9 + $0x360] sm:$0xff]  ;;  %v2025_v56 = vpack.c.bf16 %v1051_v62, %v1049_v53  ;;  %v1235_v8 = vld [vmem:[#allocation9 + $0x3c8] sm:$0xff] }
  0xe6   :  { %2006 = vmatpush1.bf16.msra.mxu0 %v2005_v7  ;;  %v2119_v7 = vpack.c.bf16 %v1217_v3, %v1211_v35  ;;  %v1241_v63 = vld [vmem:[#allocation9 + $0x3f8] sm:$0xff]  ;;  %v1053_v41 = vld [vmem:[#allocation8 + $0x420] sm:$0xff]  ;;  %v1055_v1 = vld [vmem:[#allocation8 + $0x430] sm:$0xff] }
  0xe7   :  { %2008 = vmatprep.subr.bf16.mxu0 %v2007_v14  ;;  %2110 = vmatpush1.bf16.msra.mxu1 %v2109_v17  ;;  %v884_v14 = vcombine.low %v2952_v6, %v2952_v6  ;;  %v2123_v6 = vpack.c.bf16 %v1229_v50, %v1223_v42  ;;  %v1058_v18 = vld [vmem:[#allocation8 + $0x448] sm:$0xff]  ;;  %v1060_v32 = vld [vmem:[#allocation8 + $0x458] sm:$0xff]  ;;  %v1234_v34 = vld [vmem:[#allocation9 + $0x3c0] sm:$0xff] }
  0xe8   :  { %2112 = vmatprep.subr.bf16.mxu1 %v2111_v2  ;;  %v2127_v2 = vpack.c.bf16 %v1241_v63, %v1235_v8  ;;  %v1240_v20 = vld [vmem:[#allocation9 + $0x3f0] sm:$0xff]  ;;  %v1247_v4 = vld [vmem:[#allocation9 + $0x428] sm:$0xff]  ;;  %v1253_v5 = vld [vmem:[#allocation9 + $0x458] sm:$0xff] }
  0xe9   :  { %v917_v9 = vsel %vm914_vm6, %v910_v13, %v884_v14  ;;  %v1057_v24 = vld [vmem:[#allocation8 + $0x440] sm:$0xff]  ;;  %v1059_v59 = vld [vmem:[#allocation8 + $0x450] sm:$0xff]  ;;  %v1062_v39 = vld [vmem:[#allocation8 + $0x468] sm:$0xff]  ;;  %v2131_v28 = vpack.c.bf16 %v1253_v5, %v1247_v4 }
  0xea   :  { %2010 = vmatpush1.bf16.msra.mxu0 %v2009_v43  ;;  %v1228_v43 = vld [vmem:[#allocation9 + $0x390] sm:$0xff]  ;;  %v1064_v54 = vld [vmem:[#allocation8 + $0x478] sm:$0xff]  ;;  %v1246_v47 = vld [vmem:[#allocation9 + $0x420] sm:$0xff]  ;;  %v2033_v16 = vpack.c.bf16 %v1059_v59, %v1057_v24 }
  0xeb   :  { %2012 = vmatprep.subr.bf16.mxu0 %v2011_v48  ;;  %2114 = vmatpush1.bf16.msra.mxu1 %v2113_v55  ;;  %v2027_v48 = vpack.c.bf16 %v1056_v58, %v1054_v0  ;;  %v2125_v17 = vpack.c.bf16 %v1228_v43, %v1222_v46  ;;  %v2129_v55 = vpack.c.bf16 %v1240_v20, %v1234_v34  ;;  %v1259_v12 = vld [vmem:[#allocation9 + $0x488] sm:$0xff]  ;;  %v1061_v3 = vld [vmem:[#allocation8 + $0x460] sm:$0xff]  ;;  %v1068_v61 = vld [vmem:[#allocation8 + $0x498] sm:$0xff] }
  0xec   :  { %v763_v22 = vld [vmem:[#allocation2 + $0x2c] sm:$0xf]  ;;  %2116 = vmatprep.subr.bf16.mxu1 %v2115_v60  ;;  %v1252_v60 = vld [vmem:[#allocation9 + $0x450] sm:$0xff]  ;;  %v2035_v35 = vpack.c.bf16 %v1064_v54, %v1062_v39  ;;  %v1066_v29 = vld [vmem:[#allocation8 + $0x488] sm:$0xff] }
  0xed   :  { %v765_v51 = vmul.f32 0.125, %v763_v22  ;;  %v2133_v31 = vpack.c.bf16 %v1252_v60, %v1246_v47  ;;  %v1258_v57 = vld [vmem:[#allocation9 + $0x480] sm:$0xff]  ;;  %v1264_v22 = vld [vmem:[#allocation9 + $0x4b0] sm:$0xff]  ;;  %v2039_v15 = vpack.c.bf16 %v1068_v61, %v1066_v29  ;;  %v1072_v27 = vld [vmem:[#allocation8 + $0x4b8] sm:$0xff] }
  0xee   :  { %2014 = vmatpush1.bf16.msra.mxu0 %v2013_v30  ;;  %v2029_v30 = vpack.c.bf16 %v1055_v1, %v1053_v41  ;;  %v1067_v36 = vld [vmem:[#allocation8 + $0x490] sm:$0xff]  ;;  %v1069_v50 = vld [vmem:[#allocation8 + $0x4a0] sm:$0xff]  ;;  %v1074_v13 = vld [vmem:[#allocation8 + $0x4c8] sm:$0xff] }
  0xef   :  { %2016 = vmatprep.subr.bf16.mxu0 %v2015_v45  ;;  %v885_v52 = vcombine.low %v765_v51, %v765_v51  ;;  %2118 = vmatpush1.bf16.msra.mxu1 %v2117_v49  ;;  %v2031_v45 = vpack.c.bf16 %v1060_v32, %v1058_v18  ;;  %v1065_v51 = vld [vmem:[#allocation8 + $0x480] sm:$0xff]  ;;  %v1076_v53 = vld [vmem:[#allocation8 + $0x4d8] sm:$0xff]  ;;  %v1075_v58 = vld [vmem:[#allocation8 + $0x4d0] sm:$0xff] }
  0xf0   :  { %2120 = vmatprep.subr.bf16.mxu1 %v2119_v7  ;;  %v1070_v7 = vld [vmem:[#allocation8 + $0x4a8] sm:$0xff]  ;;  %v2041_v14 = vpack.c.bf16 %v1067_v36, %v1065_v51  ;;  %v1073_v0 = vld [vmem:[#allocation8 + $0x4c0] sm:$0xff]  ;;  %v1084_v8 = vld [vmem:[#allocation8 + $0x518] sm:$0xff] }
  0xf1   :  { %v3143_v40 = vrot.slane %v885_v52, %v2630_v10  ;;  %v2043_v42 = vpack.c.bf16 %v1072_v27, %v1070_v7  ;;  %v2047_v52 = vpack.c.bf16 %v1076_v53, %v1074_v13  ;;  %v1077_v43 = vld [vmem:[#allocation8 + $0x4e0] sm:$0xff]  ;;  %v1083_v1 = vld [vmem:[#allocation8 + $0x510] sm:$0xff]  ;;  %v1088_v18 = vld [vmem:[#allocation8 + $0x538] sm:$0xff]  ;;  %v859_v13 = vcombine.low %v3133_v33, %v3133_v33 }
  0xf2   :  { %2018 = vmatpush1.bf16.msra.mxu0 %v2017_v19  ;;  %v1265_v19 = vld [vmem:[#allocation9 + $0x4b8] sm:$0xff]  ;;  %v1081_v41 = vld [vmem:[#allocation8 + $0x500] sm:$0xff]  ;;  %v1087_v34 = vld [vmem:[#allocation8 + $0x530] sm:$0xff] }
  0xf3   :  { %2020 = vmatprep.subr.bf16.mxu0 %v2019_v26  ;;  %v920_v11 = vsel %vm914_vm6, %v913_v44, %v3143_v40  ;;  %2122 = vmatpush1.bf16.msra.mxu1 %v2121_v38  ;;  %v1063_v26 = vld [vmem:[#allocation8 + $0x470] sm:$0xff]  ;;  %v2135_v25 = vpack.c.bf16 %v1265_v19, %v1259_v12  ;;  %v1078_v44 = vld [vmem:[#allocation8 + $0x4e8] sm:$0xff]  ;;  %v1080_v38 = vld [vmem:[#allocation8 + $0x4f8] sm:$0xff]  ;;  %v2057_v32 = vpack.c.bf16 %v1083_v1, %v1081_v41 }
  0xf4   :  { %2124 = vmatprep.subr.bf16.mxu1 %v2123_v6  ;;  %v2037_v49 = vpack.c.bf16 %v1063_v26, %v1061_v3  ;;  %v2049_v6 = vpack.c.bf16 %v1075_v58, %v1073_v0  ;;  %v2051_v46 = vpack.c.bf16 %v1080_v38, %v1078_v44  ;;  %v1090_v20 = vld [vmem:[#allocation8 + $0x548] sm:$0xff]  ;;  %v1091_v24 = vld [vmem:[#allocation8 + $0x550] sm:$0xff]  ;;  %v1096_v39 = vld [vmem:[#allocation8 + $0x578] sm:$0xff] }
  0xf5   :  { %v1094_v59 = vld [vmem:[#allocation8 + $0x568] sm:$0xff]  ;;  %v1095_v47 = vld [vmem:[#allocation8 + $0x570] sm:$0xff]  ;;  %v1104_v29 = vld [vmem:[#allocation8 + $0x5b8] sm:$0xff] }
  0xf6   :  { %2022 = vmatpush1.bf16.msra.mxu0 %v2021_v37  ;;  %v2137_v37 = vpack.c.bf16 %v1264_v22, %v1258_v57  ;;  %v1098_v60 = vld [vmem:[#allocation8 + $0x588] sm:$0xff]  ;;  %v1099_v3 = vld [vmem:[#allocation8 + $0x590] sm:$0xff]  ;;  %v1105_v36 = vld [vmem:[#allocation8 + $0x5c0] sm:$0xff] }
  0xf7   :  { %2024 = vmatprep.subr.bf16.mxu0 %v2023_v21  ;;  %2126 = vmatpush1.bf16.msra.mxu1 %v2125_v17  ;;  %v1071_v21 = vld [vmem:[#allocation8 + $0x4b0] sm:$0xff]  ;;  %v1102_v26 = vld [vmem:[#allocation8 + $0x5a8] sm:$0xff]  ;;  %v1277_v44 = vld [vmem:[#allocation9 + $0x518] sm:$0xff] }
  0xf8   :  { %2128 = vmatprep.subr.bf16.mxu1 %v2127_v2  ;;  %v2045_v62 = vpack.c.bf16 %v1071_v21, %v1069_v50  ;;  %v1085_v2 = vld [vmem:[#allocation8 + $0x520] sm:$0xff]  ;;  %v1103_v57 = vld [vmem:[#allocation8 + $0x5b0] sm:$0xff]  ;;  %v1106_v22 = vld [vmem:[#allocation8 + $0x5c8] sm:$0xff] }
  0xf9   :  { %1454 = vmatmul.mubr.f32.vlgmr.msra.gmra.mrb[0].mxu0 %v917_v9  ;;  %v1079_v9 = vld [vmem:[#allocation8 + $0x4f0] sm:$0xff]  ;;  %v2061_v4 = vpack.c.bf16 %v1087_v34, %v1085_v2  ;;  %v1110_v27 = vld [vmem:[#allocation8 + $0x5e8] sm:$0xff]  ;;  %v1109_v50 = vld [vmem:[#allocation8 + $0x5e0] sm:$0xff] }
  0xfa   :  { %2026 = vmatpush1.bf16.msra.mxu0 %v2025_v56  ;;  %1524 = vmatprep.mubr.f32.mxu0 %v920_v11  ;;  %v1082_v56 = vld [vmem:[#allocation8 + $0x508] sm:$0xff]  ;;  %v2053_v63 = vpack.c.bf16 %v1079_v9, %v1077_v43  ;;  %v1107_v7 = vld [vmem:[#allocation8 + $0x5d0] sm:$0xff]  ;;  %v1289_v9 = vld [vmem:[#allocation9 + $0x578] sm:$0xff] }
  0xfb   :  { %2028 = vmatprep.subr.bf16.mxu0 %v2027_v48  ;;  %2130 = vmatpush1.bf16.msra.mxu1 %v2129_v55  ;;  %v2055_v48 = vpack.c.bf16 %v1084_v8, %v1082_v56  ;;  %v1086_v11 = vld [vmem:[#allocation8 + $0x528] sm:$0xff]  ;;  %v2067_v55 = vpack.c.bf16 %v1096_v39, %v1094_v59  ;;  %v1111_v21 = vld [vmem:[#allocation8 + $0x5f0] sm:$0xff]  ;;  %v1294_v41 = vld [vmem:[#allocation9 + $0x5a0] sm:$0xff] }
  0xfc   :  { %2132 = vmatprep.subr.bf16.mxu1 %v2131_v28  ;;  %v2059_v17 = vpack.c.bf16 %v1088_v18, %v1086_v11  ;;  %v1093_v28 = vld [vmem:[#allocation8 + $0x560] sm:$0xff]  ;;  %v2085_v53 = vpack.c.bf16 %v1111_v21, %v1109_v50  ;;  %v1271_v58 = vld [vmem:[#allocation9 + $0x4e8] sm:$0xff]  ;;  %v1288_v8 = vld [vmem:[#allocation9 + $0x570] sm:$0xff] }
  0xfd   :  { %v2069_v12 = vpack.c.bf16 %v1095_v47, %v1093_v28  ;;  %v2139_v38 = vpack.c.bf16 %v1277_v44, %v1271_v58  ;;  %v1283_v33 = vld [vmem:[#allocation9 + $0x548] sm:$0xff]  ;;  %v1300_v11 = vld [vmem:[#allocation9 + $0x5d0] sm:$0xff]  ;;  %v1158_v44 = vld [vmem:[#allocation9 + $0x160] sm:$0xff] }
  0xfe   :  { %2030 = vmatpush1.bf16.msra.mxu0 %v2029_v30  ;;  %v1092_v30 = vld [vmem:[#allocation8 + $0x558] sm:$0xff]  ;;  %v2143_v56 = vpack.c.bf16 %v1289_v9, %v1283_v33  ;;  %v2149_v18 = vpack.c.bf16 %v1300_v11, %v1294_v41  ;;  %v3286_v34 = vld [vmem:[#allocation16_spill] sm:$0xff]  ;;  %v1170_v9 = vld [vmem:[#allocation9 + $0x1c0] sm:$0xff] }
  0xff   :  { %2032 = vmatprep.subr.bf16.mxu0 %v2031_v45  ;;  %2134 = vmatpush1.bf16.msra.mxu1 %v2133_v31  ;;  %v2063_v5 = vpack.c.bf16 %v1092_v30, %v1090_v20  ;;  %v1089_v45 = vld [vmem:[#allocation8 + $0x540] sm:$0xff]  ;;  %v2075_v31 = vpack.c.bf16 %v1104_v29, %v1102_v26  ;;  %v1310_v20 = vsub.s32 0, %v3286_v34  ;;  %v1113_v30 = vld [vmem:[%s3202_s3] sm:$0x3]  ;;  %v1189_v41 = vld [vmem:[#allocation9 + $0x258] sm:$0xff] }
 0x100   :  { %2136 = vmatprep.subr.bf16.mxu1 %v2135_v25  ;;  %v2065_v54 = vpack.c.bf16 %v1091_v24, %v1089_v45  ;;  %v1101_v25 = vld [vmem:[#allocation8 + $0x5a0] sm:$0xff]  ;;  %v1116_v26 = vld [vmem:[#allocation9 + $0x10] sm:$0xff] }
 0x101   :  { %v1122_v29 = vld [vmem:[#allocation9 + $0x40] sm:$0xff]  ;;  %v1140_v21 = vld [vmem:[#allocation9 + $0xd0] sm:$0xff] }
 0x102   :  { %2034 = vmatpush1.bf16.msra.mxu0 %v2033_v16  ;;  %v1100_v16 = vld [vmem:[#allocation8 + $0x598] sm:$0xff]  ;;  %v1152_v58 = vld [vmem:[#allocation9 + $0x130] sm:$0xff] }
 0x103   :  { %2036 = vmatprep.subr.bf16.mxu0 %v2035_v35  ;;  %2138 = vmatpush1.bf16.msra.mxu1 %v2137_v37  ;;  %v2071_v19 = vpack.c.bf16 %v1100_v16, %v1098_v60  ;;  %v1097_v35 = vld [vmem:[#allocation8 + $0x580] sm:$0xff]  ;;  %v1112_v37 = vld [vmem:[#allocation8 + $0x5f8] sm:$0xff]  ;;  %v1164_v33 = vld [vmem:[#allocation9 + $0x190] sm:$0xff] }
 0x104   :  { %v2073_v61 = vpack.c.bf16 %v1099_v3, %v1097_v35  ;;  %2140 = vmatprep.subr.bf16.mxu1 %v2139_v38  ;;  %v1165_v38 = vld [vmem:[#allocation9 + $0x198] sm:$0xff] }
 0x106   :  { %2038 = vmatpush1.bf16.msra.mxu0 %v2037_v49  ;;  %v1108_v49 = vld [vmem:[#allocation8 + $0x5d8] sm:$0xff] }
 0x107   :  { %2040 = vmatprep.subr.bf16.mxu0 %v2039_v15  ;;  %v2077_v15 = vpack.c.bf16 %v1103_v57, %v1101_v25  ;;  %v2079_v51 = vpack.c.bf16 %v1108_v49, %v1106_v22  ;;  %v1129_v25 = vld [vmem:[#allocation9 + $0x78] sm:$0xff]  ;;  %v1135_v57 = vld [vmem:[#allocation9 + $0xa8] sm:$0xff] }
 0x10a   :  { %2042 = vmatpush1.bf16.msra.mxu0 %v2041_v14  ;;  %v2081_v14 = vpack.c.bf16 %v1107_v7, %v1105_v36  ;;  %v2155_v36 = vpack.c.bf16 %v1135_v57, %v1129_v25  ;;  %v1128_v7 = vld [vmem:[#allocation9 + $0x70] sm:$0xff] }
 0x10b   :  { %2044 = vmatprep.subr.bf16.mxu0 %v2043_v42  ;;  %v2083_v42 = vpack.c.bf16 %v1112_v37, %v1110_v27  ;;  %v1134_v27 = vld [vmem:[#allocation9 + $0xa0] sm:$0xff]  ;;  %v1141_v37 = vld [vmem:[#allocation9 + $0xd8] sm:$0xff]  ;;  %v1236_v57 = vld [vmem:[#allocation9 + $0x3d0] sm:$0xff] }
 0x10e   :  { %2046 = vmatpush1.bf16.msra.mxu0 %v2045_v62  ;;  %v893_v62 = vcombine.low %v3143_v40, %v3143_v40  ;;  %v1282_v40 = vld [vmem:[#allocation9 + $0x540] sm:$0xff] }
 0x10f   :  { %2048 = vmatprep.subr.bf16.mxu0 %v2047_v52  ;;  %v912_v52 = vsel %vm907_vm5, %v3121_v23, %v859_v13  ;;  %v1295_v23 = vld [vmem:[#allocation9 + $0x5a8] sm:$0xff]  ;;  %v1146_v13 = vld [vmem:[#allocation9 + $0x100] sm:$0xff] }
 0x110   :  { %v919_v0 = vsel %vm914_vm6, %v912_v52, %v893_v62  ;;  %v1159_v62 = vld [vmem:[#allocation9 + $0x168] sm:$0xff]  ;;  %v2161_v52 = vpack.c.bf16 %v1146_v13, %v1140_v21 }
 0x112   :  { %2050 = vmatpush1.bf16.msra.mxu0 %v2049_v6  ;;  %v1270_v6 = vld [vmem:[#allocation9 + $0x4e0] sm:$0xff] }
 0x113   :  { %2052 = vmatprep.subr.bf16.mxu0 %v2051_v46  ;;  %v1276_v46 = vld [vmem:[#allocation9 + $0x510] sm:$0xff] }
 0x114   :  { %v2141_v43 = vpack.c.bf16 %v1276_v46, %v1270_v6  ;;  %v1171_v6 = vld [vmem:[#allocation9 + $0x1c8] sm:$0xff]  ;;  %v2165_v46 = vpack.c.bf16 %v1158_v44, %v1152_v58 }
 0x116   :  { %2054 = vmatpush1.bf16.msra.mxu0 %v2053_v63  ;;  %2142 = vmatpush1.bf16.msra.mxu1 %v2141_v43  ;;  %v2145_v63 = vpack.c.bf16 %v1288_v8, %v1282_v40  ;;  %v2167_v43 = vpack.c.bf16 %v1171_v6, %v1165_v38  ;;  %v1183_v40 = vld [vmem:[#allocation9 + $0x228] sm:$0xff]  ;;  %v2169_v8 = vpack.c.bf16 %v1170_v9, %v1164_v33  ;;  %v1272_v38 = vld [vmem:[#allocation9 + $0x4f0] sm:$0xff]  ;;  %v1278_v6 = vld [vmem:[#allocation9 + $0x520] sm:$0xff] }
 0x117   :  { %2056 = vmatprep.subr.bf16.mxu0 %v2055_v48  ;;  %2144 = vmatprep.subr.bf16.mxu1 %v2143_v56  ;;  %v1301_v48 = vld [vmem:[#allocation9 + $0x5d8] sm:$0xff]  ;;  %v2205_v33 = vpack.c.bf16 %v1278_v6, %v1272_v38  ;;  %v1202_v6 = vld [vmem:[#allocation9 + $0x2c0] sm:$0xff] }
 0x118   :  { %v2147_v1 = vpack.c.bf16 %v1301_v48, %v1295_v23  ;;  %v1177_v56 = vld [vmem:[#allocation9 + $0x1f8] sm:$0xff]  ;;  %v1176_v23 = vld [vmem:[#allocation9 + $0x1f0] sm:$0xff]  ;;  %v1182_v48 = vld [vmem:[#allocation9 + $0x220] sm:$0xff] }
 0x119   :  { %v2173_v11 = vpack.c.bf16 %v1182_v48, %v1176_v23 }
 0x11a   :  { %2058 = vmatpush1.bf16.msra.mxu0 %v2057_v32  ;;  %2146 = vmatpush1.bf16.msra.mxu1 %v2145_v63  ;;  %v1117_v32 = vld [vmem:[#allocation9 + $0x18] sm:$0xff]  ;;  %v2171_v63 = vpack.c.bf16 %v1183_v40, %v1177_v56  ;;  %v1284_v56 = vld [vmem:[#allocation9 + $0x550] sm:$0xff]  ;;  %v1290_v40 = vld [vmem:[#allocation9 + $0x580] sm:$0xff] }
 0x11b   :  { %2060 = vmatprep.subr.bf16.mxu0 %v2059_v17  ;;  %2148 = vmatprep.subr.bf16.mxu1 %v2147_v1  ;;  %v1123_v17 = vld [vmem:[#allocation9 + $0x48] sm:$0xff]  ;;  %v2209_v23 = vpack.c.bf16 %v1290_v40, %v1284_v56  ;;  %v1214_v40 = vld [vmem:[#allocation9 + $0x320] sm:$0xff] }
 0x11c   :  { %v2151_v2 = vpack.c.bf16 %v1123_v17, %v1117_v32  ;;  %v1195_v1 = vld [vmem:[#allocation9 + $0x288] sm:$0xff]  ;;  %v1188_v32 = vld [vmem:[#allocation9 + $0x250] sm:$0xff]  ;;  %v1194_v17 = vld [vmem:[#allocation9 + $0x280] sm:$0xff] }
 0x11e   :  { %2062 = vmatpush1.bf16.msra.mxu0 %v2061_v4  ;;  %2150 = vmatpush1.bf16.msra.mxu1 %v2149_v18  ;;  %v1314_v4 = vsub.s32 1, %v3286_v34  ;;  %v2175_v18 = vpack.c.bf16 %v1195_v1, %v1189_v41  ;;  %v1296_v41 = vld [vmem:[#allocation9 + $0x5b0] sm:$0xff]  ;;  %v1302_v1 = vld [vmem:[#allocation9 + $0x5e0] sm:$0xff] }
 0x11f   :  { %2064 = vmatprep.subr.bf16.mxu0 %v2063_v5  ;;  %2152 = vmatprep.subr.bf16.mxu1 %v2151_v2  ;;  %v1311_v5 = vrot.slane %v1113_v30, %v1310_v20  ;;  %v1201_v2 = vld [vmem:[#allocation9 + $0x2b8] sm:$0xff] }
 0x120   :  { %v1315_v45 = vrot.slane %v1113_v30, %v1314_v4  ;;  %v1207_v30 = vld [vmem:[#allocation9 + $0x2e8] sm:$0xff] }
 0x122   :  { %2066 = vmatpush1.bf16.msra.mxu0 %v2065_v54 }
 0x123   :  { %2068 = vmatprep.subr.bf16.mxu0 %v2067_v55 }
 0x126   :  { %2070 = vmatpush1.bf16.msra.mxu0 %v2069_v12 }
 0x127   :  { %2072 = vmatprep.subr.bf16.mxu0 %v2071_v19 }
 0x12a   :  { %2074 = vmatpush1.bf16.msra.mxu0 %v2073_v61 }
 0x12b   :  { %2076 = vmatprep.subr.bf16.mxu0 %v2075_v31 }
 0x12e   :  { %2078 = vmatpush1.bf16.msra.mxu0 %v2077_v15  ;;  %v2153_v15 = vpack.c.bf16 %v1122_v29, %v1116_v26  ;;  %v1230_v26 = vld [vmem:[#allocation9 + $0x3a0] sm:$0xff]  ;;  %v1237_v29 = vld [vmem:[#allocation9 + $0x3d8] sm:$0xff] }
 0x12f   :  { %2080 = vmatprep.subr.bf16.mxu0 %v2079_v51 }
 0x132   :  { %2082 = vmatpush1.bf16.msra.mxu0 %v2081_v14  ;;  %v1147_v14 = vld [vmem:[#allocation9 + $0x108] sm:$0xff] }
 0x133   :  { %2084 = vmatprep.subr.bf16.mxu0 %v2083_v42  ;;  %v2157_v42 = vpack.c.bf16 %v1134_v27, %v1128_v7  ;;  %v2159_v50 = vpack.c.bf16 %v1147_v14, %v1141_v37  ;;  %v1248_v37 = vld [vmem:[#allocation9 + $0x430] sm:$0xff]  ;;  %v1254_v14 = vld [vmem:[#allocation9 + $0x460] sm:$0xff] }
 0x134   :  { %v2197_v21 = vpack.c.bf16 %v1254_v14, %v1248_v37  ;;  %v1178_v14 = vld [vmem:[#allocation9 + $0x200] sm:$0xff] }
 0x136   :  { %2086 = vmatpush1.bf16.msra.mxu0 %v2085_v53  ;;  %v1153_v53 = vld [vmem:[#allocation9 + $0x138] sm:$0xff] }
 0x139   :  { %1525 = vmatmul.mubr.f32.vlgmr.msra.gmra.mrb[0].mxu0 %v919_v0  ;;  %v2163_v0 = vpack.c.bf16 %v1159_v62, %v1153_v53  ;;  %v1260_v53 = vld [vmem:[#allocation9 + $0x490] sm:$0xff]  ;;  %v1266_v62 = vld [vmem:[#allocation9 + $0x4c0] sm:$0xff] }
 0x13a   :  { %v2201_v58 = vpack.c.bf16 %v1266_v62, %v1260_v53  ;;  %v1190_v62 = vld [vmem:[#allocation9 + $0x260] sm:$0xff] }
 0x20c   :  { %v1526_v24 = vpop.f32.mrb[0].mxu0 }
 0x20d   :  { %v2279_v59 = vadd.f32 %v1526_v24, %v1311_v5  ;;  %v1528_v39 = vpop.f32.mrb[1].mxu0  ;;  %v2177_v5 = vpack.c.bf16 %v1194_v17, %v1188_v32  ;;  %v1200_v24 = vld [vmem:[#allocation9 + $0x2b0] sm:$0xff]  ;;  %v2213_v32 = vpack.c.bf16 %v1302_v1, %v1296_v41  ;;  %v1226_v1 = vld [vmem:[#allocation9 + $0x380] sm:$0xff] }
 0x20e   :  { %v2280_v54 = vadd.f32 %v1528_v39, %v1315_v45  ;;  %v2179_v45 = vpack.c.bf16 %v1207_v30, %v1201_v2  ;;  %v1213_v39 = vld [vmem:[#allocation9 + $0x318] sm:$0xff]  ;;  %v1118_v2 = vld [vmem:[#allocation9 + $0x20] sm:$0xff]  ;;  %v1124_v30 = vld [vmem:[#allocation9 + $0x50] sm:$0xff] }
 0x20f   :  { %v1531_v55 = vmax.f32 %v2279_v59, 0.0  ;;  %v1206_v59 = vld [vmem:[#allocation9 + $0x2e0] sm:$0xff] }
 0x210   :  { %v1532_v28 = vmax.f32 %v2280_v54, 0.0  ;;  %v1219_v54 = vld [vmem:[#allocation9 + $0x348] sm:$0xff] }
 0x211   :  { %v1535_v47 = vrot.slane %v1531_v55, 2  ;;  %v1541_v12 = vrot.slane %v1531_v55, 4  ;;  %v1547_v22 = vrot.slane %v1531_v55, 6 }
 0x212   :  { %v1536_v60 = vrot.slane %v1532_v28, 2  ;;  %v1542_v35 = vrot.slane %v1532_v28, 4  ;;  %v1548_v31 = vrot.slane %v1532_v28, 6 }
 0x213   :  { %v1539_v16 = vadd.f32 %v1535_v47, %v1531_v55  ;;  %v2181_v55 = vpack.c.bf16 %v1206_v59, %v1200_v24  ;;  %v1212_v47 = vld [vmem:[#allocation9 + $0x310] sm:$0xff]  ;;  %v2217_v24 = vpack.c.bf16 %v1124_v30, %v1118_v2  ;;  %v1238_v30 = vld [vmem:[#allocation9 + $0x3e0] sm:$0xff] }
 0x214   :  { %v1540_v19 = vadd.f32 %v1536_v60, %v1532_v28  ;;  %v2183_v28 = vpack.c.bf16 %v1219_v54, %v1213_v39  ;;  %v1218_v60 = vld [vmem:[#allocation9 + $0x340] sm:$0xff]  ;;  %v1136_v54 = vld [vmem:[#allocation9 + $0xb0] sm:$0xff] }
 0x215   :  { %v1545_v3 = vadd.f32 %v1541_v12, %v1539_v16  ;;  %v1225_v16 = vld [vmem:[#allocation9 + $0x378] sm:$0xff]  ;;  %v1231_v12 = vld [vmem:[#allocation9 + $0x3a8] sm:$0xff]  ;;  %v1130_v39 = vld [vmem:[#allocation9 + $0x80] sm:$0xff] }
 0x216   :  { %v1546_v61 = vadd.f32 %v1542_v35, %v1540_v19  ;;  %v2185_v19 = vpack.c.bf16 %v1218_v60, %v1212_v47  ;;  %v2187_v35 = vpack.c.bf16 %v1231_v12, %v1225_v16  ;;  %v2221_v47 = vpack.c.bf16 %v1136_v54, %v1130_v39  ;;  %v1142_v16 = vld [vmem:[#allocation9 + $0xe0] sm:$0xff]  ;;  %v1148_v12 = vld [vmem:[#allocation9 + $0x110] sm:$0xff] }
 0x217   :  { %v3166_v51 = vadd.f32 %v1547_v22, %v1545_v3  ;;  %v1224_v3 = vld [vmem:[#allocation9 + $0x370] sm:$0xff]  ;;  %v1242_v22 = vld [vmem:[#allocation9 + $0x400] sm:$0xff] }
 0x218   :  { %v3164_v49 = vadd.f32 %v1548_v31, %v1546_v61  ;;  %v1243_v61 = vld [vmem:[#allocation9 + $0x408] sm:$0xff]  ;;  %v2189_v31 = vpack.c.bf16 %v1230_v26, %v1224_v3  ;;  %v2193_v7 = vpack.c.bf16 %v1242_v22, %v1236_v57  ;;  %v2225_v3 = vpack.c.bf16 %v1148_v12, %v1142_v16  ;;  %v1250_v54 = vld [vmem:[#allocation9 + $0x440] sm:$0xff] }
 0x219   :  { %v2191_v25 = vpack.c.bf16 %v1243_v61, %v1237_v29  ;;  %v1154_v29 = vld [vmem:[#allocation9 + $0x140] sm:$0xff]  ;;  %v1160_v61 = vld [vmem:[#allocation9 + $0x170] sm:$0xff] }
 0x21a   :  { %1649 = vmatprep.mubr.f32.mxu1 %v3164_v49  ;;  %v2229_v57 = vpack.c.bf16 %v1160_v61, %v1154_v29  ;;  %v1262_v12 = vld [vmem:[#allocation9 + $0x4a0] sm:$0xff] }
 0x21b   :  { %1650 = vmatmul.mubr.f32.vlgmr.msra.gmra.mrb[0].mxu1 %v3166_v51  ;;  %v1274_v61 = vld [vmem:[#allocation9 + $0x500] sm:$0xff] }
 0x21c   :  { %2154 = vmatpush1.bf16.msra.mxu1 %v2153_v15  ;;  %1720 = vmatprep.mubr.f32.mxu1 %v3164_v49  ;;  %v1249_v15 = vld [vmem:[#allocation9 + $0x438] sm:$0xff] }
 0x21d   :  { %2156 = vmatprep.subr.bf16.mxu1 %v2155_v36  ;;  %v1255_v36 = vld [vmem:[#allocation9 + $0x468] sm:$0xff] }
 0x21e   :  { %v2195_v27 = vpack.c.bf16 %v1255_v36, %v1249_v15  ;;  %v1172_v15 = vld [vmem:[#allocation9 + $0x1d0] sm:$0xff]  ;;  %v1179_v36 = vld [vmem:[#allocation9 + $0x208] sm:$0xff] }
 0x220   :  { %2158 = vmatpush1.bf16.msra.mxu1 %v2157_v42  ;;  %v1261_v42 = vld [vmem:[#allocation9 + $0x498] sm:$0xff] }
 0x221   :  { %2160 = vmatprep.subr.bf16.mxu1 %v2159_v50  ;;  %v1267_v50 = vld [vmem:[#allocation9 + $0x4c8] sm:$0xff] }
 0x222   :  { %v2199_v13 = vpack.c.bf16 %v1267_v50, %v1261_v42  ;;  %v1184_v42 = vld [vmem:[#allocation9 + $0x230] sm:$0xff]  ;;  %v1191_v50 = vld [vmem:[#allocation9 + $0x268] sm:$0xff] }
 0x224   :  { %2162 = vmatpush1.bf16.msra.mxu1 %v2161_v52  ;;  %v1273_v52 = vld [vmem:[#allocation9 + $0x4f8] sm:$0xff] }
 0x225   :  { %2164 = vmatprep.subr.bf16.mxu1 %v2163_v0  ;;  %v1279_v0 = vld [vmem:[#allocation9 + $0x528] sm:$0xff] }
 0x226   :  { %v2203_v44 = vpack.c.bf16 %v1279_v0, %v1273_v52  ;;  %v1196_v52 = vld [vmem:[#allocation9 + $0x290] sm:$0xff]  ;;  %v1203_v0 = vld [vmem:[#allocation9 + $0x2c8] sm:$0xff] }
 0x228   :  { %2166 = vmatpush1.bf16.msra.mxu1 %v2165_v46  ;;  %v1285_v46 = vld [vmem:[#allocation9 + $0x558] sm:$0xff] }
 0x229   :  { %2168 = vmatprep.subr.bf16.mxu1 %v2167_v43  ;;  %v1291_v43 = vld [vmem:[#allocation9 + $0x588] sm:$0xff] }
 0x22a   :  { %v2207_v9 = vpack.c.bf16 %v1291_v43, %v1285_v46  ;;  %v1208_v46 = vld [vmem:[#allocation9 + $0x2f0] sm:$0xff]  ;;  %v1215_v43 = vld [vmem:[#allocation9 + $0x328] sm:$0xff] }
 0x22c   :  { %2170 = vmatpush1.bf16.msra.mxu1 %v2169_v8  ;;  %v1297_v8 = vld [vmem:[#allocation9 + $0x5b8] sm:$0xff] }
 0x22d   :  { %2172 = vmatprep.subr.bf16.mxu1 %v2171_v63  ;;  %v1303_v63 = vld [vmem:[#allocation9 + $0x5e8] sm:$0xff] }
 0x22e   :  { %v2211_v48 = vpack.c.bf16 %v1303_v63, %v1297_v8  ;;  %v1220_v8 = vld [vmem:[#allocation9 + $0x350] sm:$0xff]  ;;  %v1227_v63 = vld [vmem:[#allocation9 + $0x388] sm:$0xff] }
 0x230   :  { %2174 = vmatpush1.bf16.msra.mxu1 %v2173_v11  ;;  %v1119_v11 = vld [vmem:[#allocation9 + $0x28] sm:$0xff] }
 0x231   :  { %2176 = vmatprep.subr.bf16.mxu1 %v2175_v18  ;;  %v1125_v18 = vld [vmem:[#allocation9 + $0x58] sm:$0xff] }
 0x232   :  { %v2215_v17 = vpack.c.bf16 %v1125_v18, %v1119_v11  ;;  %v1232_v11 = vld [vmem:[#allocation9 + $0x3b0] sm:$0xff]  ;;  %v1239_v18 = vld [vmem:[#allocation9 + $0x3e8] sm:$0xff] }
 0x234   :  { %2178 = vmatpush1.bf16.msra.mxu1 %v2177_v5  ;;  %v1131_v5 = vld [vmem:[#allocation9 + $0x88] sm:$0xff] }
 0x235   :  { %2180 = vmatprep.subr.bf16.mxu1 %v2179_v45  ;;  %v1137_v45 = vld [vmem:[#allocation9 + $0xb8] sm:$0xff] }
 0x236   :  { %v2219_v59 = vpack.c.bf16 %v1137_v45, %v1131_v5  ;;  %v1244_v5 = vld [vmem:[#allocation9 + $0x410] sm:$0xff]  ;;  %v1251_v45 = vld [vmem:[#allocation9 + $0x448] sm:$0xff] }
 0x238   :  { %2182 = vmatpush1.bf16.msra.mxu1 %v2181_v55  ;;  %v1143_v55 = vld [vmem:[#allocation9 + $0xe8] sm:$0xff] }
 0x239   :  { %2184 = vmatprep.subr.bf16.mxu1 %v2183_v28  ;;  %v1149_v28 = vld [vmem:[#allocation9 + $0x118] sm:$0xff] }
 0x23a   :  { %v2223_v60 = vpack.c.bf16 %v1149_v28, %v1143_v55  ;;  %v1256_v55 = vld [vmem:[#allocation9 + $0x470] sm:$0xff]  ;;  %v1263_v28 = vld [vmem:[#allocation9 + $0x4a8] sm:$0xff] }
 0x23c   :  { %2186 = vmatpush1.bf16.msra.mxu1 %v2185_v19  ;;  %v1155_v19 = vld [vmem:[#allocation9 + $0x148] sm:$0xff] }
 0x23d   :  { %2188 = vmatprep.subr.bf16.mxu1 %v2187_v35  ;;  %v1161_v35 = vld [vmem:[#allocation9 + $0x178] sm:$0xff] }
 0x23e   :  { %v2227_v26 = vpack.c.bf16 %v1161_v35, %v1155_v19  ;;  %v1268_v19 = vld [vmem:[#allocation9 + $0x4d0] sm:$0xff]  ;;  %v1275_v35 = vld [vmem:[#allocation9 + $0x508] sm:$0xff] }
 0x240   :  { %2190 = vmatpush1.bf16.msra.mxu1 %v2189_v31  ;;  %v1167_v31 = vld [vmem:[#allocation9 + $0x1a8] sm:$0xff] }
 0x241   :  { %2192 = vmatprep.subr.bf16.mxu1 %v2191_v25  ;;  %v1173_v25 = vld [vmem:[#allocation9 + $0x1d8] sm:$0xff] }
 0x242   :  { %v2231_v22 = vpack.c.bf16 %v1173_v25, %v1167_v31  ;;  %v1280_v31 = vld [vmem:[#allocation9 + $0x530] sm:$0xff]  ;;  %v1287_v25 = vld [vmem:[#allocation9 + $0x568] sm:$0xff] }
 0x244   :  { %2194 = vmatpush1.bf16.msra.mxu1 %v2193_v7  ;;  %v1185_v7 = vld [vmem:[#allocation9 + $0x238] sm:$0xff] }
 0x245   :  { %2196 = vmatprep.subr.bf16.mxu1 %v2195_v27  ;;  %v2235_v37 = vpack.c.bf16 %v1185_v7, %v1179_v36  ;;  %v1292_v36 = vld [vmem:[#allocation9 + $0x590] sm:$0xff]  ;;  %v1299_v7 = vld [vmem:[#allocation9 + $0x5c8] sm:$0xff] }
 0x248   :  { %2198 = vmatpush1.bf16.msra.mxu1 %v2197_v21  ;;  %v1197_v21 = vld [vmem:[#allocation9 + $0x298] sm:$0xff] }
 0x249   :  { %2200 = vmatprep.subr.bf16.mxu1 %v2199_v13  ;;  %v2237_v13 = vpack.c.bf16 %v1184_v42, %v1178_v14  ;;  %v2239_v53 = vpack.c.bf16 %v1197_v21, %v1191_v50  ;;  %v1298_v42 = vld [vmem:[#allocation9 + $0x5c0] sm:$0xff]  ;;  %v1304_v50 = vld [vmem:[#allocation9 + $0x5f0] sm:$0xff] }
 0x24a   :  { %v2277_v21 = vpack.c.bf16 %v1304_v50, %v1298_v42 }
 0x24c   :  { %2202 = vmatpush1.bf16.msra.mxu1 %v2201_v58  ;;  %v1209_v58 = vld [vmem:[#allocation9 + $0x2f8] sm:$0xff] }
 0x24d   :  { %2204 = vmatprep.subr.bf16.mxu1 %v2203_v44  ;;  %v2241_v44 = vpack.c.bf16 %v1196_v52, %v1190_v62  ;;  %v2243_v38 = vpack.c.bf16 %v1209_v58, %v1203_v0 }
 0x250   :  { %2206 = vmatpush1.bf16.msra.mxu1 %v2205_v33  ;;  %v1221_v33 = vld [vmem:[#allocation9 + $0x358] sm:$0xff] }
 0x251   :  { %2208 = vmatprep.subr.bf16.mxu1 %v2207_v9  ;;  %v2245_v9 = vpack.c.bf16 %v1208_v46, %v1202_v6  ;;  %v2247_v56 = vpack.c.bf16 %v1221_v33, %v1215_v43 }
 0x254   :  { %2210 = vmatpush1.bf16.msra.mxu1 %v2209_v23  ;;  %v1233_v23 = vld [vmem:[#allocation9 + $0x3b8] sm:$0xff] }
 0x255   :  { %2212 = vmatprep.subr.bf16.mxu1 %v2211_v48  ;;  %v2249_v48 = vpack.c.bf16 %v1220_v8, %v1214_v40  ;;  %v2251_v41 = vpack.c.bf16 %v1233_v23, %v1227_v63  ;;  %v1565_v8 = vsub.s32 2, %v3286_v34 }
 0x258   :  { %2214 = vmatpush1.bf16.msra.mxu1 %v2213_v32  ;;  %v1245_v32 = vld [vmem:[#allocation9 + $0x418] sm:$0xff] }
 0x259   :  { %2216 = vmatprep.subr.bf16.mxu1 %v2215_v17  ;;  %v2253_v17 = vpack.c.bf16 %v1232_v11, %v1226_v1  ;;  %v2255_v2 = vpack.c.bf16 %v1245_v32, %v1239_v18 }
 0x25b   :  { %1721 = vmatmul.mubr.f32.vlgmr.msra.gmra.mrb[2].mxu1 %v3166_v51 }
 0x25c   :  { %2218 = vmatpush1.bf16.msra.mxu1 %v2217_v24  ;;  %1791 = vmatprep.mubr.f32.mxu1 %v3164_v49  ;;  %v1166_v49 = vld [vmem:[#allocation9 + $0x1a0] sm:$0xff]  ;;  %v1257_v24 = vld [vmem:[#allocation9 + $0x478] sm:$0xff] }
 0x25d   :  { %2220 = vmatprep.subr.bf16.mxu1 %v2219_v59  ;;  %v2233_v27 = vpack.c.bf16 %v1172_v15, %v1166_v49  ;;  %v2257_v59 = vpack.c.bf16 %v1244_v5, %v1238_v30  ;;  %v2259_v39 = vpack.c.bf16 %v1257_v24, %v1251_v45  ;;  %v1286_v15 = vld [vmem:[#allocation9 + $0x560] sm:$0xff] }
 0x260   :  { %2222 = vmatpush1.bf16.msra.mxu1 %v2221_v47  ;;  %v1269_v47 = vld [vmem:[#allocation9 + $0x4d8] sm:$0xff] }
 0x261   :  { %2224 = vmatprep.subr.bf16.mxu1 %v2223_v60  ;;  %v2261_v60 = vpack.c.bf16 %v1256_v55, %v1250_v54  ;;  %v2263_v16 = vpack.c.bf16 %v1269_v47, %v1263_v28  ;;  %v1573_v28 = vsub.s32 4, %v3286_v34  ;;  %v1577_v47 = vsub.s32 5, %v3286_v34 }
 0x264   :  { %2226 = vmatpush1.bf16.msra.mxu1 %v2225_v3  ;;  %v1281_v3 = vld [vmem:[#allocation9 + $0x538] sm:$0xff] }
 0x265   :  { %2228 = vmatprep.subr.bf16.mxu1 %v2227_v26  ;;  %v2265_v26 = vpack.c.bf16 %v1268_v19, %v1262_v12  ;;  %v2267_v29 = vpack.c.bf16 %v1281_v3, %v1275_v35 }
 0x268   :  { %2230 = vmatpush1.bf16.msra.mxu1 %v2229_v57  ;;  %v1293_v57 = vld [vmem:[#allocation9 + $0x598] sm:$0xff] }
 0x269   :  { %2232 = vmatprep.subr.bf16.mxu1 %v2231_v22  ;;  %v2269_v22 = vpack.c.bf16 %v1280_v31, %v1274_v61  ;;  %v2271_v49 = vpack.c.bf16 %v1293_v57, %v1287_v25 }
 0x26c   :  { %2234 = vmatpush1.bf16.msra.mxu1 %v2233_v27  ;;  %v1305_v27 = vld [vmem:[#allocation9 + $0x5f8] sm:$0xff] }
 0x26d   :  { %2236 = vmatprep.subr.bf16.mxu1 %v2235_v37  ;;  %v2273_v37 = vpack.c.bf16 %v1292_v36, %v1286_v15  ;;  %v2275_v14 = vpack.c.bf16 %v1305_v27, %v1299_v7 }
 0x270   :  { %2238 = vmatpush1.bf16.msra.mxu1 %v2237_v13  ;;  %v1306_v13 = vld [vmem:[%s3204_s5] sm:$0x3f]  ;;  %s2450_s5 = smov [#allocation11]  }
 0x271   :  { %2240 = vmatprep.subr.bf16.mxu1 %v2239_v53  ;;  %v1553_v53 = vmul.f32 4.0, %v1306_v13  ;;  %s1875_s23 = sshll.u32 %s2450_s5, 4  ;;  %s1876_s23 = int_to_ptr.vmem [resolvable:$true] %s1875_s23 }
 0x272   :  { %s2409_s25 = scalar_lea.vmem %s1876_s23, 192  ;;  %p2414_p5 = scmp.lt.s32.totalorder %s1876_s23, %s1876_s23 }
 0x273   :  { %v1558_v62 = vrot.slane %v1553_v53, %v1310_v20  ;;  %v1562_v52 = vrot.slane %v1553_v53, %v1314_v4  ;;  %v1569_v4 = vsub.s32 3, %v3286_v34  ;;  %v1566_v63 = vrot.slane %v1553_v53, %v1565_v8  ;;  %p2410_p4 = scmp.ne.s32.totalorder %s1876_s23, %s2409_s25  ;;  %p2415_p6 = scmp.lt.s32.totalorder %s2409_s25, %s2409_s25 }
 0x274   :  { %2242 = vmatpush1.bf16.msra.mxu1 %v2241_v44 }
 0x275   :  { %2244 = vmatprep.subr.bf16.mxu1 %v2243_v38  ;;  %v1570_v23 = vrot.slane %v1553_v53, %v1569_v4  ;;  %p2416_p7 = por %p2415_p6, %p2414_p5 }
 0x277   :  { %p2417_p8 = pnand %p2416_p7, %p2410_p4 }
 0x278   :  { %2246 = vmatpush1.bf16.msra.mxu1 %v2245_v9 }
 0x279   :  { %2248 = vmatprep.subr.bf16.mxu1 %v2247_v56 }
 0x27c   :  { %2250 = vmatpush1.bf16.msra.mxu1 %v2249_v48 }
 0x27d   :  { %2252 = vmatprep.subr.bf16.mxu1 %v2251_v41 }
 0x280   :  { %2254 = vmatpush1.bf16.msra.mxu1 %v2253_v17 }
 0x281   :  { %2256 = vmatprep.subr.bf16.mxu1 %v2255_v2 }
 0x284   :  { %2258 = vmatpush1.bf16.msra.mxu1 %v2257_v59 }
 0x285   :  { %2260 = vmatprep.subr.bf16.mxu1 %v2259_v39 }
 0x288   :  { %2262 = vmatpush1.bf16.msra.mxu1 %v2261_v60  ;;  %v1574_v60 = vrot.slane %v1553_v53, %v1573_v28 }
 0x289   :  { %2264 = vmatprep.subr.bf16.mxu1 %v2263_v16  ;;  %v1578_v16 = vrot.slane %v1553_v53, %v1577_v47 }
 0x28c   :  { %2266 = vmatpush1.bf16.msra.mxu1 %v2265_v26 }
 0x28d   :  { %2268 = vmatprep.subr.bf16.mxu1 %v2267_v29 }
 0x290   :  { %2270 = vmatpush1.bf16.msra.mxu1 %v2269_v22 }
 0x291   :  { %2272 = vmatprep.subr.bf16.mxu1 %v2271_v49 }
 0x294   :  { %2274 = vmatpush1.bf16.msra.mxu1 %v2273_v37 }
 0x295   :  { %2276 = vmatprep.subr.bf16.mxu1 %v2275_v14 }
 0x298   :  { %2278 = vmatpush1.bf16.msra.mxu1 %v2277_v21 }
 0x29b   :  { %1792 = vmatmul.mubr.f32.vlgmr.msra.gmra.mrb[4].mxu1 %v3166_v51 }
 0x2ee   :  { %v1651_v0 = vpop.f32.mrb[0].mxu1 }
 0x2ef   :  { %v1652_v58 = vadd.f32 %v1651_v0, %v1558_v62  ;;  %v1653_v44 = vpop.f32.mrb[1].mxu1 }
 0x2f0   :  { %v1654_v38 = vadd.f32 %v1653_v44, %v1562_v52 }
 0x2f1   :  { %v1888_v6 = vmul.f32 -1.442695, %v1652_v58 }
 0x2f2   :  { %v1889_v46 = vmul.f32 -1.442695, %v1654_v38 }
 0x2f3   :  { %2297 = vpow2.f32 %v1888_v6 }
 0x2f4   :  { %2299 = vpow2.f32 %v1889_v46 }
 0x2fd   :  { %v2298_v51 = vpop.eup %2297 }
 0x2fe   :  { %v2300_v43 = vpop.eup %2299  ;;  %v1816_v33 = vadd.f32 1.0, %v2298_v51 }
 0x2ff   :  { %v1817_v9 = vadd.f32 1.0, %v2300_v43 }
 0x300   :  { %2301 = vrcp.f32 %v1816_v33 }
 0x301   :  { %2303 = vrcp.f32 %v1817_v9 }
 0x30a   :  { %v2302_v56 = vpop.eup %2301 }
 0x30b   :  { %v2304_v40 = vpop.eup %2303 }
 0x30c   :  { %v1840_v20 = vcombine.low %v2302_v56, %v2304_v40 }
 0x30e   :  { %v1848_v39 = vrot.slane %v1840_v20, %v2630_v10 }
 0x32e   :  { %v1722_v48 = vpop.f32.mrb[2].mxu1 }
 0x32f   :  { %v1723_v41 = vadd.f32 %v1722_v48, %v1566_v63  ;;  %v1724_v1 = vpop.f32.mrb[3].mxu1 }
 0x330   :  { %v1725_v11 = vadd.f32 %v1724_v1, %v1570_v23 }
 0x331   :  { %v1890_v18 = vmul.f32 -1.442695, %v1723_v41 }
 0x332   :  { %v1891_v32 = vmul.f32 -1.442695, %v1725_v11 }
 0x333   :  { %2305 = vpow2.f32 %v1890_v18 }
 0x334   :  { %2307 = vpow2.f32 %v1891_v32 }
 0x33d   :  { %v2306_v17 = vpop.eup %2305 }
 0x33e   :  { %v2308_v2 = vpop.eup %2307  ;;  %v1818_v30 = vadd.f32 1.0, %v2306_v17 }
 0x33f   :  { %v1819_v5 = vadd.f32 1.0, %v2308_v2 }
 0x340   :  { %2309 = vrcp.f32 %v1818_v30 }
 0x341   :  { %2311 = vrcp.f32 %v1819_v5 }
 0x34a   :  { %v2310_v45 = vpop.eup %2309 }
 0x34b   :  { %v2312_v24 = vpop.eup %2311 }
 0x34c   :  { %v1841_v59 = vcombine.low %v2310_v45, %v2312_v24 }
 0x34e   :  { %v1855_v54 = vrot.slane %v1841_v59, %v2630_v10 }
 0x350   :  { %v1856_v55 = vcombine.low %v1848_v39, %v1855_v54 }
 0x352   :  { %1867 = vst [vmem:[#allocation11] sm:$0xff] %v1856_v55 }
 0x36e   :  { %v1793_v12 = vpop.f32.mrb[4].mxu1 }
 0x36f   :  { %v1794_v19 = vadd.f32 %v1793_v12, %v1574_v60  ;;  %v1795_v35 = vpop.f32.mrb[5].mxu1 }
 0x370   :  { %v1796_v3 = vadd.f32 %v1795_v35, %v1578_v16 }
 0x371   :  { %v1892_v26 = vmul.f32 -1.442695, %v1794_v19 }
 0x372   :  { %v1893_v29 = vmul.f32 -1.442695, %v1796_v3 }
 0x373   :  { %2313 = vpow2.f32 %v1892_v26 }
 0x374   :  { %2315 = vpow2.f32 %v1893_v29 }
 0x37d   :  { %v2314_v61 = vpop.eup %2313 }
 0x37e   :  { %v2316_v31 = vpop.eup %2315  ;;  %v1820_v25 = vadd.f32 1.0, %v2314_v61 }
 0x37f   :  { %v1821_v10 = vadd.f32 1.0, %v2316_v31 }
 0x380   :  { %2317 = vrcp.f32 %v1820_v25 }
 0x381   :  { %2319 = vrcp.f32 %v1821_v10 }
 0x38a   :  { %v2318_v57 = vpop.eup %2317 }
 0x38b   :  { %v2320_v34 = vpop.eup %2319 }
 0x38c   :  { %v1857_v22 = vcombine.low %v2318_v57, %v2320_v34 }
 0x38e   :  { %1894 = vst.sshfl [vmem:[#allocation11 + $0x8] sm:$0x33 pattern:$0x76325410] %v1857_v22 }
 0x38f   :  { %2420 = shalt.err (!%p2417_p8)
}
 0x390   :  { %s2421_s28 = scalar_lea.hbm %s3205_s6, 192 }
 0x391   :  { %p2422_p9 = scmp.ne.s32.totalorder %s3205_s6, %s2421_s28  ;;  %p2425_p10 = scmp.lt.u32.totalorder %s2421_s28, %s3205_s6 }
 0x393   :  { %p2427_p11 = pnand %p2425_p10, %p2422_p9 }
 0x395   :  { %2430 = shalt.err (!%p2427_p11)
}
 0x396   :  { %1878 = dma.vmem_to_hbm [thread:$0]  %s1876_s23, 192, %s3205_s6, [#allocation5]  }
 0x397   :  { %2437 = dma.done.wait [#allocation5], 192  }
 0x398   :  { %2438 = vsyncadd [#allocation5], 4294967104 }
 0x399   :  { %1882 = vsyncpa [#allocation4], 1 }
 0x39a   :  { %1883 = vsyncpa [#allocation7], 1 }
 0x39b   :  { %1884 = vsyncpa [#allocation10], 1 }
 0x39c   :  { %1885 = vsyncpa [#allocation5], 1 }

</bundles_post_ra>
